<compile_context>
chip_gen: v7x
topology: tpu7x:2x2x1
jax: 0.10.0
libtpu: 0.0.40
codegen_flags: <defaults>
</compile_context>

<pallas_src>
import jax
import jax.numpy as jnp
from jax.experimental import pallas as pl
from jax.experimental.pallas import tpu as pltpu


# ----------------------------- recurrence kernel -----------------------------

def _lstm_recurrence_kernel(emb_ref, h0_ref, c0_ref, w_ref, b_ref,
                            hids_ref, h_ref, c_ref):
    """One grid step = TS timesteps of the LSTM recurrence.

    emb_ref  : (TS, B, H)  this chunk's input embeddings
    w_ref    : (2H, 4H)    fused [W_ih^T ; W_hh^T]
    b_ref    : (1, 4H)     b_ih + b_hh
    hids_ref : (TS, B, H)  all hidden states (consumed by the projection kernel)
    h_ref/c_ref : (B, H)   recurrent carry; constant out-block index => these
                           stay VMEM-resident across the sequential time grid.
    """
    t = pl.program_id(0)
    ts = emb_ref.shape[0]
    H = h_ref.shape[1]

    @pl.when(t == 0)
    def _():
        h_ref[...] = h0_ref[...]
        c_ref[...] = c0_ref[...]

    w = w_ref[...]              # (2H, 4H), loop-invariant, loaded once per chunk
    b = b_ref[...]              # (1, 4H)

    h = h_ref[...]              # read carry once per TS-step chunk
    c = c_ref[...]
    # TS is small and static: a fully unrolled static loop keeps all indices
    # static and gives the scheduler the whole chunk at once.
    for s in range(ts):
        x = emb_ref[s]                                   # (B, H)
        xh = jnp.concatenate([x, h], axis=1)             # (B, 2H)
        # Single fused gate matmul, PyTorch gate order i, f, g, o.
        gates = jnp.dot(xh, w, preferred_element_type=jnp.float32) + b
        i_g = jax.nn.sigmoid(gates[:, 0 * H:1 * H])
        f_g = jax.nn.sigmoid(gates[:, 1 * H:2 * H])
        g_g = jnp.tanh(gates[:, 2 * H:3 * H])
        o_g = jax.nn.sigmoid(gates[:, 3 * H:4 * H])
        c = f_g * c + i_g * g_g
        h = o_g * jnp.tanh(c)
        hids_ref[s] = h.astype(hids_ref.dtype)

    h_ref[...] = h              # write carry once per chunk
    c_ref[...] = c


# ----------------------------- projection kernel -----------------------------

def _proj_kernel(h_ref, w_ref, b_ref, out_ref):
    # logits tile = hids tile @ (tied weight)^T tile + bias tile
    out_ref[...] = (
        jnp.dot(h_ref[...], w_ref[...], preferred_element_type=jnp.float32)
        + b_ref[...]).astype(out_ref.dtype)


# --------------------------------- wrapper -----------------------------------

def lstm_lm_forward(tokens, params, hid=None, *, ts=8, tile_m=256, tile_v=512):
    """Pallas forward of LstmLm.

    tokens: (T, B) int32
    returns: (logits (T, B, V), (h (1, B, H), c (1, B, H)))
    """
    lut_w = params["lut_weight"]          # (V, H) -- also the tied proj weight
    w_ih = params["w_ih"]                 # (4H, H)
    w_hh = params["w_hh"]                 # (4H, H)
    b_ih = params["b_ih"]                 # (4H,)
    b_hh = params["b_hh"]                 # (4H,)
    proj_b = params["proj_bias"]          # (V,)

    V, H = lut_w.shape
    T, B = tokens.shape

    # Embedding lookup (data-dependent gather): plain-JAX glue.
    emb = lut_w[tokens].astype(jnp.float32)              # (T, B, H)

    if hid is None:
        h0 = jnp.zeros((B, H), jnp.float32)
        c0 = jnp.zeros((B, H), jnp.float32)
    else:
        h0, c0 = hid
        h0 = h0.reshape(B, H).astype(jnp.float32)
        c0 = c0.reshape(B, H).astype(jnp.float32)

    # Fused gate weight [W_ih^T ; W_hh^T] -> (2H, 4H); combined bias (1, 4H).
    w_fused = jnp.concatenate([w_ih.T, w_hh.T], axis=0)
    bias = (b_ih + b_hh).reshape(1, 4 * H)

    # Timesteps per grid step (must divide T).
    ts_eff = 1
    for cand in (ts, 8, 4, 2, 1):
        if cand >= 1 and T % cand == 0:
            ts_eff = cand
            break

    recur_grid = pltpu.PrefetchScalarGridSpec(
        num_scalar_prefetch=0,
        grid=(T // ts_eff,),
        in_specs=[
            pl.BlockSpec((ts_eff, B, H), lambda t: (t, 0, 0)),   # embeddings
            pl.BlockSpec((B, H), lambda t: (0, 0)),              # h0
            pl.BlockSpec((B, H), lambda t: (0, 0)),              # c0
            pl.BlockSpec((2 * H, 4 * H), lambda t: (0, 0)),      # fused weight
            pl.BlockSpec((1, 4 * H), lambda t: (0, 0)),          # combined bias
        ],
        out_specs=[
            pl.BlockSpec((ts_eff, B, H), lambda t: (t, 0, 0)),   # hidden states
            pl.BlockSpec((B, H), lambda t: (0, 0)),              # final h (carry)
            pl.BlockSpec((B, H), lambda t: (0, 0)),              # final c (carry)
        ],
    )

    hids, h_fin, c_fin = pl.pallas_call(
        _lstm_recurrence_kernel,
        grid_spec=recur_grid,
        out_shape=(
            jax.ShapeDtypeStruct((T, B, H), jnp.float32),
            jax.ShapeDtypeStruct((B, H), jnp.float32),
            jax.ShapeDtypeStruct((B, H), jnp.float32),
        ),
        compiler_params=pltpu.CompilerParams(
            dimension_semantics=("arbitrary",),                  # time recurrence
            vmem_limit_bytes=64 * 1024 * 1024,
        ),
    )(emb, h0, c0, w_fused, bias)

    # ----- tied-weight projection: one batched (T*B, H) x (H, V) matmul -----
    M = T * B
    hids_flat = hids.reshape(M, H)
    proj_w_t = lut_w.T                                   # (H, V), tied weights
    proj_b2 = proj_b.reshape(1, V)

    tm = M if M <= tile_m else tile_m                    # multiple of 8 or == M
    tv = V if V <= tile_v else tile_v                    # multiple of 128 or == V

    proj_grid = pltpu.PrefetchScalarGridSpec(
        num_scalar_prefetch=0,
        grid=(pl.cdiv(M, tm), pl.cdiv(V, tv)),
        in_specs=[
            pl.BlockSpec((tm, H), lambda m, v: (m, 0)),          # hidden states
            pl.BlockSpec((H, tv), lambda m, v: (0, v)),          # V-tiled weight
            pl.BlockSpec((1, tv), lambda m, v: (0, v)),          # V-tiled bias
        ],
        out_specs=pl.BlockSpec((tm, tv), lambda m, v: (m, v)),
    )

    logits_flat = pl.pallas_call(
        _proj_kernel,
        grid_spec=proj_grid,
        out_shape=jax.ShapeDtypeStruct((M, V), jnp.float32),
        compiler_params=pltpu.CompilerParams(
            dimension_semantics=("parallel", "parallel"),        # megacore-able
            vmem_limit_bytes=64 * 1024 * 1024,
        ),
    )(hids_flat, proj_w_t, proj_b2)

    logits = logits_flat.reshape(T, B, V)
    # Match torch.nn.LSTM hidden shape (num_layers=1, B, H).
    return logits, (h_fin[None], c_fin[None])


# -------------------------------- reference ----------------------------------

def lstm_lm_reference(tokens, params, hid=None):
    """Pure-JAX reference (lax.scan) mirroring torch semantics."""
    lut_w = params["lut_weight"]
    w_ih, w_hh = params["w_ih"], params["w_hh"]
    b = params["b_ih"] + params["b_hh"]
    proj_b = params["proj_bias"]
    V, H = lut_w.shape
    T, B = tokens.shape

    emb = lut_w[tokens]
    if hid is None:
        h0 = jnp.zeros((B, H), jnp.float32)
        c0 = jnp.zeros((B, H), jnp.float32)
    else:
        h0, c0 = hid
        h0, c0 = h0.reshape(B, H), c0.reshape(B, H)

    def step(carry, x):
        h, c = carry
        gates = x @ w_ih.T + h @ w_hh.T + b
        i = jax.nn.sigmoid(gates[:, 0 * H:1 * H])
        f = jax.nn.sigmoid(gates[:, 1 * H:2 * H])
        g = jnp.tanh(gates[:, 2 * H:3 * H])
        o = jax.nn.sigmoid(gates[:, 3 * H:4 * H])
        c_new = f * c + i * g
        h_new = o * jnp.tanh(c_new)
        return (h_new, c_new), h_new

    (h_fin, c_fin), hids = jax.lax.scan(step, (h0, c0), emb)
    logits = hids @ lut_w.T + proj_b
    return logits, (h_fin[None], c_fin[None])


def make_params(key, vsize, nhid):
    ks = jax.random.split(key, 6)
    s = 1.0 / jnp.sqrt(nhid)
    return {
        "lut_weight": jax.random.normal(ks[0], (vsize, nhid), jnp.float32) * s,
        "w_ih": jax.random.normal(ks[1], (4 * nhid, nhid), jnp.float32) * s,
        "w_hh": jax.random.normal(ks[2], (4 * nhid, nhid), jnp.float32) * s,
        "b_ih": jax.random.normal(ks[3], (4 * nhid,), jnp.float32) * s,
        "b_hh": jax.random.normal(ks[4], (4 * nhid,), jnp.float32) * s,
        "proj_bias": jax.random.normal(ks[5], (vsize,), jnp.float32) * s,
    }


if __name__ == "__main__":
    key = jax.random.PRNGKey(0)
    k_par, k_tok = jax.random.split(key)

    # Small but lane-aligned shapes: H a multiple of 128 keeps the four gate
    # slices vreg-aligned; T*B = 128 fills one full MXU M-tile in the
    # projection kernel; V = 256 exercises the V-tiled projection spec.
    T, B, H, V = 16, 8, 128, 256
    params = make_params(k_par, V, H)
    tokens = jax.random.randint(k_tok, (T, B), 0, V, dtype=jnp.int32)

    logits, (h, c) = lstm_lm_forward(tokens, params, hid=None)
    logits = jax.block_until_ready(logits)
    h = jax.block_until_ready(h)
    c = jax.block_until_ready(c)

    ref_logits, (ref_h, ref_c) = lstm_lm_reference(tokens, params, hid=None)

    assert logits.shape == (T, B, V)
    assert h.shape == (1, B, H) and c.shape == (1, B, H)
    assert jnp.allclose(logits, ref_logits, atol=1e-3, rtol=1e-3)
    assert jnp.allclose(h, ref_h, atol=1e-3, rtol=1e-3)
    assert jnp.allclose(c, ref_c, atol=1e-3, rtol=1e-3)

    print("KERNEL_OK")
</pallas_src>

<mosaic_0001>
module attributes {stable_mosaic.version = 11 : i64} {
  func.func @_lstm_recurrence_kernel(%arg0: i32, %arg1: memref<8x8x128xf32, #tpu.memory_space<vmem>>, %arg2: memref<8x128xf32, #tpu.memory_space<vmem>>, %arg3: memref<8x128xf32, #tpu.memory_space<vmem>>, %arg4: memref<256x512xf32, #tpu.memory_space<vmem>>, %arg5: memref<1x512xf32, #tpu.memory_space<vmem>>, %arg6: memref<8x8x128xf32, #tpu.memory_space<vmem>>, %arg7: memref<8x128xf32, #tpu.memory_space<vmem>>, %arg8: memref<8x128xf32, #tpu.memory_space<vmem>>) attributes {dimension_semantics = [#tpu.dimension_semantics<arbitrary>], iteration_bounds = array<i64: 2>, scalar_prefetch = 0 : i64, scratch_operands = 0 : i64, tpu.core_type = #tpu.core_type<tc>, window_params = [{transform_indices = @transform_0, window_bounds = array<i64: 8, 8, 128>}, {pipeline_mode = #tpu.pipeline_mode<synchronous>, transform_indices = @transform_1, window_bounds = array<i64: 8, 128>}, {pipeline_mode = #tpu.pipeline_mode<synchronous>, transform_indices = @transform_2, window_bounds = array<i64: 8, 128>}, {pipeline_mode = #tpu.pipeline_mode<synchronous>, transform_indices = @transform_3, window_bounds = array<i64: 256, 512>}, {pipeline_mode = #tpu.pipeline_mode<synchronous>, transform_indices = @transform_4, window_bounds = array<i64: 1, 512>}, {transform_indices = @transform_5, window_bounds = array<i64: 8, 8, 128>}, {pipeline_mode = #tpu.pipeline_mode<synchronous>, transform_indices = @transform_6, window_bounds = array<i64: 8, 128>}, {pipeline_mode = #tpu.pipeline_mode<synchronous>, transform_indices = @transform_7, window_bounds = array<i64: 8, 128>}]} {
    %c0_i32 = arith.constant 0 : i32
    %0 = arith.cmpi eq, %arg0, %c0_i32 : i32
    %1 = arith.extui %0 : i1 to i32
    %c0_i32_0 = arith.constant 0 : i32
    %2 = arith.cmpi ne, %1, %c0_i32_0 : i32
    scf.if %2 {
      %c0_84 = arith.constant 0 : index
      %c0_85 = arith.constant 0 : index
      %281 = vector.load %arg2[%c0_84, %c0_85] : memref<8x128xf32, #tpu.memory_space<vmem>>, vector<8x128xf32>
      %c0_86 = arith.constant 0 : index
      %c0_87 = arith.constant 0 : index
      %282 = vector.load %arg7[%c0_86, %c0_87] : memref<8x128xf32, #tpu.memory_space<vmem>>, vector<8x128xf32>
      tpu.vector_store %arg7[%c0_86, %c0_87], %281 {strides = array<i32>} : memref<8x128xf32, #tpu.memory_space<vmem>>, vector<8x128xf32>,
      %c0_88 = arith.constant 0 : index
      %c0_89 = arith.constant 0 : index
      %283 = vector.load %arg3[%c0_88, %c0_89] : memref<8x128xf32, #tpu.memory_space<vmem>>, vector<8x128xf32>
      %c0_90 = arith.constant 0 : index
      %c0_91 = arith.constant 0 : index
      %284 = vector.load %arg8[%c0_90, %c0_91] : memref<8x128xf32, #tpu.memory_space<vmem>>, vector<8x128xf32>
      tpu.vector_store %arg8[%c0_90, %c0_91], %283 {strides = array<i32>} : memref<8x128xf32, #tpu.memory_space<vmem>>, vector<8x128xf32>,
    } else {
    }
    %c0 = arith.constant 0 : index
    %c0_1 = arith.constant 0 : index
    %3 = vector.load %arg4[%c0, %c0_1] : memref<256x512xf32, #tpu.memory_space<vmem>>, vector<256x512xf32>
    %c0_2 = arith.constant 0 : index
    %c0_3 = arith.constant 0 : index
    %4 = vector.load %arg5[%c0_2, %c0_3] : memref<1x512xf32, #tpu.memory_space<vmem>>, vector<1x512xf32>
    %c0_4 = arith.constant 0 : index
    %c0_5 = arith.constant 0 : index
    %5 = vector.load %arg7[%c0_4, %c0_5] : memref<8x128xf32, #tpu.memory_space<vmem>>, vector<8x128xf32>
    %c0_6 = arith.constant 0 : index
    %c0_7 = arith.constant 0 : index
    %6 = vector.load %arg8[%c0_6, %c0_7] : memref<8x128xf32, #tpu.memory_space<vmem>>, vector<8x128xf32>
    %c0_8 = arith.constant 0 : index
    %c0_9 = arith.constant 0 : index
    %c0_10 = arith.constant 0 : index
    %7 = vector.load %arg1[%c0_8, %c0_9, %c0_10] : memref<8x8x128xf32, #tpu.memory_space<vmem>>, vector<1x8x128xf32>
    %8 = vector.shape_cast %7 : vector<1x8x128xf32> to vector<8x128xf32>
    %9 = tpu.concatenate %8, %5 in 1 : vector<8x128xf32>, vector<8x128xf32> -> vector<8x256xf32>
    %cst = arith.constant dense<0.000000e+00> : vector<8x512xf32>
    %10 = tpu.matmul %9, %3, %cst {dimension_numbers = #tpu.dot_dimension_numbers<[1], [0], [0], [1], [0, 0, 1, 1], [], []>} : vector<8x256xf32>, vector<256x512xf32>, vector<8x512xf32> -> vector<8x512xf32>
    %11 = vector.broadcast %4 : vector<1x512xf32> to vector<8x512xf32>
    %12 = arith.addf %10, %11 : vector<8x512xf32>
    %13 = vector.extract_strided_slice %12 {offsets = [0, 0], sizes = [8, 128], strides = [1, 1]} : vector<8x512xf32> to vector<8x128xf32>
    %14 = arith.negf %13 : vector<8x128xf32>
    %15 = math.exp %14 : vector<8x128xf32>
    %cst_11 = arith.constant 1.000000e+00 : f32
    %16 = vector.broadcast %cst_11 : f32 to vector<8x128xf32>
    %17 = arith.addf %16, %15 : vector<8x128xf32>
    %18 = arith.divf %16, %17 : vector<8x128xf32>
    %19 = vector.extract_strided_slice %12 {offsets = [0, 128], sizes = [8, 128], strides = [1, 1]} : vector<8x512xf32> to vector<8x128xf32>
    %20 = arith.negf %19 : vector<8x128xf32>
    %21 = math.exp %20 : vector<8x128xf32>
    %cst_12 = arith.constant 1.000000e+00 : f32
    %22 = vector.broadcast %cst_12 : f32 to vector<8x128xf32>
    %23 = arith.addf %22, %21 : vector<8x128xf32>
    %24 = arith.divf %22, %23 : vector<8x128xf32>
    %25 = vector.extract_strided_slice %12 {offsets = [0, 256], sizes = [8, 128], strides = [1, 1]} : vector<8x512xf32> to vector<8x128xf32>
    %26 = math.tanh %25 : vector<8x128xf32>
    %27 = vector.extract_strided_slice %12 {offsets = [0, 384], sizes = [8, 128], strides = [1, 1]} : vector<8x512xf32> to vector<8x128xf32>
    %28 = arith.negf %27 : vector<8x128xf32>
    %29 = math.exp %28 : vector<8x128xf32>
    %cst_13 = arith.constant 1.000000e+00 : f32
    %30 = vector.broadcast %cst_13 : f32 to vector<8x128xf32>
    %31 = arith.addf %30, %29 : vector<8x128xf32>
    %32 = arith.divf %30, %31 : vector<8x128xf32>
    %33 = arith.mulf %24, %6 : vector<8x128xf32>
    %34 = arith.mulf %18, %26 : vector<8x128xf32>
    %35 = arith.addf %33, %34 : vector<8x128xf32>
    %36 = math.tanh %35 : vector<8x128xf32>
    %37 = arith.mulf %32, %36 : vector<8x128xf32>
    %c0_14 = arith.constant 0 : index
    %c0_15 = arith.constant 0 : index
    %c0_16 = arith.constant 0 : index
    %38 = vector.load %arg6[%c0_14, %c0_15, %c0_16] : memref<8x8x128xf32, #tpu.memory_space<vmem>>, vector<1x8x128xf32>
    %39 = vector.shape_cast %38 : vector<1x8x128xf32> to vector<8x128xf32>
    %40 = vector.shape_cast %37 : vector<8x128xf32> to vector<1x8x128xf32>
    tpu.vector_store %arg6[%c0_14, %c0_15, %c0_16], %40 {strides = array<i32>} : memref<8x8x128xf32, #tpu.memory_space<vmem>>, vector<1x8x128xf32>,
    %c1 = arith.constant 1 : index
    %c0_17 = arith.constant 0 : index
    %c0_18 = arith.constant 0 : index
    %41 = vector.load %arg1[%c1, %c0_17, %c0_18] : memref<8x8x128xf32, #tpu.memory_space<vmem>>, vector<1x8x128xf32>
    %42 = vector.shape_cast %41 : vector<1x8x128xf32> to vector<8x128xf32>
    %43 = tpu.concatenate %42, %37 in 1 : vector<8x128xf32>, vector<8x128xf32> -> vector<8x256xf32>
    %cst_19 = arith.constant dense<0.000000e+00> : vector<8x512xf32>
    %44 = tpu.matmul %43, %3, %cst_19 {dimension_numbers = #tpu.dot_dimension_numbers<[1], [0], [0], [1], [0, 0, 1, 1], [], []>} : vector<8x256xf32>, vector<256x512xf32>, vector<8x512xf32> -> vector<8x512xf32>
    %45 = vector.broadcast %4 : vector<1x512xf32> to vector<8x512xf32>
    %46 = arith.addf %44, %45 : vector<8x512xf32>
    %47 = vector.extract_strided_slice %46 {offsets = [0, 0], sizes = [8, 128], strides = [1, 1]} : vector<8x512xf32> to vector<8x128xf32>
    %48 = arith.negf %47 : vector<8x128xf32>
    %49 = math.exp %48 : vector<8x128xf32>
    %cst_20 = arith.constant 1.000000e+00 : f32
    %50 = vector.broadcast %cst_20 : f32 to vector<8x128xf32>
    %51 = arith.addf %50, %49 : vector<8x128xf32>
    %52 = arith.divf %50, %51 : vector<8x128xf32>
    %53 = vector.extract_strided_slice %46 {offsets = [0, 128], sizes = [8, 128], strides = [1, 1]} : vector<8x512xf32> to vector<8x128xf32>
    %54 = arith.negf %53 : vector<8x128xf32>
    %55 = math.exp %54 : vector<8x128xf32>
    %cst_21 = arith.constant 1.000000e+00 : f32
    %56 = vector.broadcast %cst_21 : f32 to vector<8x128xf32>
    %57 = arith.addf %56, %55 : vector<8x128xf32>
    %58 = arith.divf %56, %57 : vector<8x128xf32>
    %59 = vector.extract_strided_slice %46 {offsets = [0, 256], sizes = [8, 128], strides = [1, 1]} : vector<8x512xf32> to vector<8x128xf32>
    %60 = math.tanh %59 : vector<8x128xf32>
    %61 = vector.extract_strided_slice %46 {offsets = [0, 384], sizes = [8, 128], strides = [1, 1]} : vector<8x512xf32> to vector<8x128xf32>
    %62 = arith.negf %61 : vector<8x128xf32>
    %63 = math.exp %62 : vector<8x128xf32>
    %cst_22 = arith.constant 1.000000e+00 : f32
    %64 = vector.broadcast %cst_22 : f32 to vector<8x128xf32>
    %65 = arith.addf %64, %63 : vector<8x128xf32>
    %66 = arith.divf %64, %65 : vector<8x128xf32>
    %67 = arith.mulf %58, %35 : vector<8x128xf32>
    %68 = arith.mulf %52, %60 : vector<8x128xf32>
    %69 = arith.addf %67, %68 : vector<8x128xf32>
    %70 = math.tanh %69 : vector<8x128xf32>
    %71 = arith.mulf %66, %70 : vector<8x128xf32>
    %c1_23 = arith.constant 1 : index
    %c0_24 = arith.constant 0 : index
    %c0_25 = arith.constant 0 : index
    %72 = vector.load %arg6[%c1_23, %c0_24, %c0_25] : memref<8x8x128xf32, #tpu.memory_space<vmem>>, vector<1x8x128xf32>
    %73 = vector.shape_cast %72 : vector<1x8x128xf32> to vector<8x128xf32>
    %74 = vector.shape_cast %71 : vector<8x128xf32> to vector<1x8x128xf32>
    tpu.vector_store %arg6[%c1_23, %c0_24, %c0_25], %74 {strides = array<i32>} : memref<8x8x128xf32, #tpu.memory_space<vmem>>, vector<1x8x128xf32>,
    %c2 = arith.constant 2 : index
    %c0_26 = arith.constant 0 : index
    %c0_27 = arith.constant 0 : index
    %75 = vector.load %arg1[%c2, %c0_26, %c0_27] : memref<8x8x128xf32, #tpu.memory_space<vmem>>, vector<1x8x128xf32>
    %76 = vector.shape_cast %75 : vector<1x8x128xf32> to vector<8x128xf32>
    %77 = tpu.concatenate %76, %71 in 1 : vector<8x128xf32>, vector<8x128xf32> -> vector<8x256xf32>
    %cst_28 = arith.constant dense<0.000000e+00> : vector<8x512xf32>
    %78 = tpu.matmul %77, %3, %cst_28 {dimension_numbers = #tpu.dot_dimension_numbers<[1], [0], [0], [1], [0, 0, 1, 1], [], []>} : vector<8x256xf32>, vector<256x512xf32>, vector<8x512xf32> -> vector<8x512xf32>
    %79 = vector.broadcast %4 : vector<1x512xf32> to vector<8x512xf32>
    %80 = arith.addf %78, %79 : vector<8x512xf32>
    %81 = vector.extract_strided_slice %80 {offsets = [0, 0], sizes = [8, 128], strides = [1, 1]} : vector<8x512xf32> to vector<8x128xf32>
    %82 = arith.negf %81 : vector<8x128xf32>
    %83 = math.exp %82 : vector<8x128xf32>
    %cst_29 = arith.constant 1.000000e+00 : f32
    %84 = vector.broadcast %cst_29 : f32 to vector<8x128xf32>
    %85 = arith.addf %84, %83 : vector<8x128xf32>
    %86 = arith.divf %84, %85 : vector<8x128xf32>
    %87 = vector.extract_strided_slice %80 {offsets = [0, 128], sizes = [8, 128], strides = [1, 1]} : vector<8x512xf32> to vector<8x128xf32>
    %88 = arith.negf %87 : vector<8x128xf32>
    %89 = math.exp %88 : vector<8x128xf32>
    %cst_30 = arith.constant 1.000000e+00 : f32
    %90 = vector.broadcast %cst_30 : f32 to vector<8x128xf32>
    %91 = arith.addf %90, %89 : vector<8x128xf32>
    %92 = arith.divf %90, %91 : vector<8x128xf32>
    %93 = vector.extract_strided_slice %80 {offsets = [0, 256], sizes = [8, 128], strides = [1, 1]} : vector<8x512xf32> to vector<8x128xf32>
    %94 = math.tanh %93 : vector<8x128xf32>
    %95 = vector.extract_strided_slice %80 {offsets = [0, 384], sizes = [8, 128], strides = [1, 1]} : vector<8x512xf32> to vector<8x128xf32>
    %96 = arith.negf %95 : vector<8x128xf32>
    %97 = math.exp %96 : vector<8x128xf32>
    %cst_31 = arith.constant 1.000000e+00 : f32
    %98 = vector.broadcast %cst_31 : f32 to vector<8x128xf32>
    %99 = arith.addf %98, %97 : vector<8x128xf32>
    %100 = arith.divf %98, %99 : vector<8x128xf32>
    %101 = arith.mulf %92, %69 : vector<8x128xf32>
    %102 = arith.mulf %86, %94 : vector<8x128xf32>
    %103 = arith.addf %101, %102 : vector<8x128xf32>
    %104 = math.tanh %103 : vector<8x128xf32>
    %105 = arith.mulf %100, %104 : vector<8x128xf32>
    %c2_32 = arith.constant 2 : index
    %c0_33 = arith.constant 0 : index
    %c0_34 = arith.constant 0 : index
    %106 = vector.load %arg6[%c2_32, %c0_33, %c0_34] : memref<8x8x128xf32, #tpu.memory_space<vmem>>, vector<1x8x128xf32>
    %107 = vector.shape_cast %106 : vector<1x8x128xf32> to vector<8x128xf32>
    %108 = vector.shape_cast %105 : vector<8x128xf32> to vector<1x8x128xf32>
    tpu.vector_store %arg6[%c2_32, %c0_33, %c0_34], %108 {strides = array<i32>} : memref<8x8x128xf32, #tpu.memory_space<vmem>>, vector<1x8x128xf32>,
    %c3 = arith.constant 3 : index
    %c0_35 = arith.constant 0 : index
    %c0_36 = arith.constant 0 : index
    %109 = vector.load %arg1[%c3, %c0_35, %c0_36] : memref<8x8x128xf32, #tpu.memory_space<vmem>>, vector<1x8x128xf32>
    %110 = vector.shape_cast %109 : vector<1x8x128xf32> to vector<8x128xf32>
    %111 = tpu.concatenate %110, %105 in 1 : vector<8x128xf32>, vector<8x128xf32> -> vector<8x256xf32>
    %cst_37 = arith.constant dense<0.000000e+00> : vector<8x512xf32>
    %112 = tpu.matmul %111, %3, %cst_37 {dimension_numbers = #tpu.dot_dimension_numbers<[1], [0], [0], [1], [0, 0, 1, 1], [], []>} : vector<8x256xf32>, vector<256x512xf32>, vector<8x512xf32> -> vector<8x512xf32>
    %113 = vector.broadcast %4 : vector<1x512xf32> to vector<8x512xf32>
    %114 = arith.addf %112, %113 : vector<8x512xf32>
    %115 = vector.extract_strided_slice %114 {offsets = [0, 0], sizes = [8, 128], strides = [1, 1]} : vector<8x512xf32> to vector<8x128xf32>
    %116 = arith.negf %115 : vector<8x128xf32>
    %117 = math.exp %116 : vector<8x128xf32>
    %cst_38 = arith.constant 1.000000e+00 : f32
    %118 = vector.broadcast %cst_38 : f32 to vector<8x128xf32>
    %119 = arith.addf %118, %117 : vector<8x128xf32>
    %120 = arith.divf %118, %119 : vector<8x128xf32>
    %121 = vector.extract_strided_slice %114 {offsets = [0, 128], sizes = [8, 128], strides = [1, 1]} : vector<8x512xf32> to vector<8x128xf32>
    %122 = arith.negf %121 : vector<8x128xf32>
    %123 = math.exp %122 : vector<8x128xf32>
    %cst_39 = arith.constant 1.000000e+00 : f32
    %124 = vector.broadcast %cst_39 : f32 to vector<8x128xf32>
    %125 = arith.addf %124, %123 : vector<8x128xf32>
    %126 = arith.divf %124, %125 : vector<8x128xf32>
    %127 = vector.extract_strided_slice %114 {offsets = [0, 256], sizes = [8, 128], strides = [1, 1]} : vector<8x512xf32> to vector<8x128xf32>
    %128 = math.tanh %127 : vector<8x128xf32>
    %129 = vector.extract_strided_slice %114 {offsets = [0, 384], sizes = [8, 128], strides = [1, 1]} : vector<8x512xf32> to vector<8x128xf32>
    %130 = arith.negf %129 : vector<8x128xf32>
    %131 = math.exp %130 : vector<8x128xf32>
    %cst_40 = arith.constant 1.000000e+00 : f32
    %132 = vector.broadcast %cst_40 : f32 to vector<8x128xf32>
    %133 = arith.addf %132, %131 : vector<8x128xf32>
    %134 = arith.divf %132, %133 : vector<8x128xf32>
    %135 = arith.mulf %126, %103 : vector<8x128xf32>
    %136 = arith.mulf %120, %128 : vector<8x128xf32>
    %137 = arith.addf %135, %136 : vector<8x128xf32>
    %138 = math.tanh %137 : vector<8x128xf32>
    %139 = arith.mulf %134, %138 : vector<8x128xf32>
    %c3_41 = arith.constant 3 : index
    %c0_42 = arith.constant 0 : index
    %c0_43 = arith.constant 0 : index
    %140 = vector.load %arg6[%c3_41, %c0_42, %c0_43] : memref<8x8x128xf32, #tpu.memory_space<vmem>>, vector<1x8x128xf32>
    %141 = vector.shape_cast %140 : vector<1x8x128xf32> to vector<8x128xf32>
    %142 = vector.shape_cast %139 : vector<8x128xf32> to vector<1x8x128xf32>
    tpu.vector_store %arg6[%c3_41, %c0_42, %c0_43], %142 {strides = array<i32>} : memref<8x8x128xf32, #tpu.memory_space<vmem>>, vector<1x8x128xf32>,
    %c4 = arith.constant 4 : index
    %c0_44 = arith.constant 0 : index
    %c0_45 = arith.constant 0 : index
    %143 = vector.load %arg1[%c4, %c0_44, %c0_45] : memref<8x8x128xf32, #tpu.memory_space<vmem>>, vector<1x8x128xf32>
    %144 = vector.shape_cast %143 : vector<1x8x128xf32> to vector<8x128xf32>
    %145 = tpu.concatenate %144, %139 in 1 : vector<8x128xf32>, vector<8x128xf32> -> vector<8x256xf32>
    %cst_46 = arith.constant dense<0.000000e+00> : vector<8x512xf32>
    %146 = tpu.matmul %145, %3, %cst_46 {dimension_numbers = #tpu.dot_dimension_numbers<[1], [0], [0], [1], [0, 0, 1, 1], [], []>} : vector<8x256xf32>, vector<256x512xf32>, vector<8x512xf32> -> vector<8x512xf32>
    %147 = vector.broadcast %4 : vector<1x512xf32> to vector<8x512xf32>
    %148 = arith.addf %146, %147 : vector<8x512xf32>
    %149 = vector.extract_strided_slice %148 {offsets = [0, 0], sizes = [8, 128], strides = [1, 1]} : vector<8x512xf32> to vector<8x128xf32>
    %150 = arith.negf %149 : vector<8x128xf32>
    %151 = math.exp %150 : vector<8x128xf32>
    %cst_47 = arith.constant 1.000000e+00 : f32
    %152 = vector.broadcast %cst_47 : f32 to vector<8x128xf32>
    %153 = arith.addf %152, %151 : vector<8x128xf32>
    %154 = arith.divf %152, %153 : vector<8x128xf32>
    %155 = vector.extract_strided_slice %148 {offsets = [0, 128], sizes = [8, 128], strides = [1, 1]} : vector<8x512xf32> to vector<8x128xf32>
    %156 = arith.negf %155 : vector<8x128xf32>
    %157 = math.exp %156 : vector<8x128xf32>
    %cst_48 = arith.constant 1.000000e+00 : f32
    %158 = vector.broadcast %cst_48 : f32 to vector<8x128xf32>
    %159 = arith.addf %158, %157 : vector<8x128xf32>
    %160 = arith.divf %158, %159 : vector<8x128xf32>
    %161 = vector.extract_strided_slice %148 {offsets = [0, 256], sizes = [8, 128], strides = [1, 1]} : vector<8x512xf32> to vector<8x128xf32>
    %162 = math.tanh %161 : vector<8x128xf32>
    %163 = vector.extract_strided_slice %148 {offsets = [0, 384], sizes = [8, 128], strides = [1, 1]} : vector<8x512xf32> to vector<8x128xf32>
    %164 = arith.negf %163 : vector<8x128xf32>
    %165 = math.exp %164 : vector<8x128xf32>
    %cst_49 = arith.constant 1.000000e+00 : f32
    %166 = vector.broadcast %cst_49 : f32 to vector<8x128xf32>
    %167 = arith.addf %166, %165 : vector<8x128xf32>
    %168 = arith.divf %166, %167 : vector<8x128xf32>
    %169 = arith.mulf %160, %137 : vector<8x128xf32>
    %170 = arith.mulf %154, %162 : vector<8x128xf32>
    %171 = arith.addf %169, %170 : vector<8x128xf32>
    %172 = math.tanh %171 : vector<8x128xf32>
    %173 = arith.mulf %168, %172 : vector<8x128xf32>
    %c4_50 = arith.constant 4 : index
    %c0_51 = arith.constant 0 : index
    %c0_52 = arith.constant 0 : index
    %174 = vector.load %arg6[%c4_50, %c0_51, %c0_52] : memref<8x8x128xf32, #tpu.memory_space<vmem>>, vector<1x8x128xf32>
    %175 = vector.shape_cast %174 : vector<1x8x128xf32> to vector<8x128xf32>
    %176 = vector.shape_cast %173 : vector<8x128xf32> to vector<1x8x128xf32>
    tpu.vector_store %arg6[%c4_50, %c0_51, %c0_52], %176 {strides = array<i32>} : memref<8x8x128xf32, #tpu.memory_space<vmem>>, vector<1x8x128xf32>,
    %c5 = arith.constant 5 : index
    %c0_53 = arith.constant 0 : index
    %c0_54 = arith.constant 0 : index
    %177 = vector.load %arg1[%c5, %c0_53, %c0_54] : memref<8x8x128xf32, #tpu.memory_space<vmem>>, vector<1x8x128xf32>
    %178 = vector.shape_cast %177 : vector<1x8x128xf32> to vector<8x128xf32>
    %179 = tpu.concatenate %178, %173 in 1 : vector<8x128xf32>, vector<8x128xf32> -> vector<8x256xf32>
    %cst_55 = arith.constant dense<0.000000e+00> : vector<8x512xf32>
    %180 = tpu.matmul %179, %3, %cst_55 {dimension_numbers = #tpu.dot_dimension_numbers<[1], [0], [0], [1], [0, 0, 1, 1], [], []>} : vector<8x256xf32>, vector<256x512xf32>, vector<8x512xf32> -> vector<8x512xf32>
    %181 = vector.broadcast %4 : vector<1x512xf32> to vector<8x512xf32>
    %182 = arith.addf %180, %181 : vector<8x512xf32>
    %183 = vector.extract_strided_slice %182 {offsets = [0, 0], sizes = [8, 128], strides = [1, 1]} : vector<8x512xf32> to vector<8x128xf32>
    %184 = arith.negf %183 : vector<8x128xf32>
    %185 = math.exp %184 : vector<8x128xf32>
    %cst_56 = arith.constant 1.000000e+00 : f32
    %186 = vector.broadcast %cst_56 : f32 to vector<8x128xf32>
    %187 = arith.addf %186, %185 : vector<8x128xf32>
    %188 = arith.divf %186, %187 : vector<8x128xf32>
    %189 = vector.extract_strided_slice %182 {offsets = [0, 128], sizes = [8, 128], strides = [1, 1]} : vector<8x512xf32> to vector<8x128xf32>
    %190 = arith.negf %189 : vector<8x128xf32>
    %191 = math.exp %190 : vector<8x128xf32>
    %cst_57 = arith.constant 1.000000e+00 : f32
    %192 = vector.broadcast %cst_57 : f32 to vector<8x128xf32>
    %193 = arith.addf %192, %191 : vector<8x128xf32>
    %194 = arith.divf %192, %193 : vector<8x128xf32>
    %195 = vector.extract_strided_slice %182 {offsets = [0, 256], sizes = [8, 128], strides = [1, 1]} : vector<8x512xf32> to vector<8x128xf32>
    %196 = math.tanh %195 : vector<8x128xf32>
    %197 = vector.extract_strided_slice %182 {offsets = [0, 384], sizes = [8, 128], strides = [1, 1]} : vector<8x512xf32> to vector<8x128xf32>
    %198 = arith.negf %197 : vector<8x128xf32>
    %199 = math.exp %198 : vector<8x128xf32>
    %cst_58 = arith.constant 1.000000e+00 : f32
    %200 = vector.broadcast %cst_58 : f32 to vector<8x128xf32>
    %201 = arith.addf %200, %199 : vector<8x128xf32>
    %202 = arith.divf %200, %201 : vector<8x128xf32>
    %203 = arith.mulf %194, %171 : vector<8x128xf32>
    %204 = arith.mulf %188, %196 : vector<8x128xf32>
    %205 = arith.addf %203, %204 : vector<8x128xf32>
    %206 = math.tanh %205 : vector<8x128xf32>
    %207 = arith.mulf %202, %206 : vector<8x128xf32>
    %c5_59 = arith.constant 5 : index
    %c0_60 = arith.constant 0 : index
    %c0_61 = arith.constant 0 : index
    %208 = vector.load %arg6[%c5_59, %c0_60, %c0_61] : memref<8x8x128xf32, #tpu.memory_space<vmem>>, vector<1x8x128xf32>
    %209 = vector.shape_cast %208 : vector<1x8x128xf32> to vector<8x128xf32>
    %210 = vector.shape_cast %207 : vector<8x128xf32> to vector<1x8x128xf32>
    tpu.vector_store %arg6[%c5_59, %c0_60, %c0_61], %210 {strides = array<i32>} : memref<8x8x128xf32, #tpu.memory_space<vmem>>, vector<1x8x128xf32>,
    %c6 = arith.constant 6 : index
    %c0_62 = arith.constant 0 : index
    %c0_63 = arith.constant 0 : index
    %211 = vector.load %arg1[%c6, %c0_62, %c0_63] : memref<8x8x128xf32, #tpu.memory_space<vmem>>, vector<1x8x128xf32>
    %212 = vector.shape_cast %211 : vector<1x8x128xf32> to vector<8x128xf32>
    %213 = tpu.concatenate %212, %207 in 1 : vector<8x128xf32>, vector<8x128xf32> -> vector<8x256xf32>
    %cst_64 = arith.constant dense<0.000000e+00> : vector<8x512xf32>
    %214 = tpu.matmul %213, %3, %cst_64 {dimension_numbers = #tpu.dot_dimension_numbers<[1], [0], [0], [1], [0, 0, 1, 1], [], []>} : vector<8x256xf32>, vector<256x512xf32>, vector<8x512xf32> -> vector<8x512xf32>
    %215 = vector.broadcast %4 : vector<1x512xf32> to vector<8x512xf32>
    %216 = arith.addf %214, %215 : vector<8x512xf32>
    %217 = vector.extract_strided_slice %216 {offsets = [0, 0], sizes = [8, 128], strides = [1, 1]} : vector<8x512xf32> to vector<8x128xf32>
    %218 = arith.negf %217 : vector<8x128xf32>
    %219 = math.exp %218 : vector<8x128xf32>
    %cst_65 = arith.constant 1.000000e+00 : f32
    %220 = vector.broadcast %cst_65 : f32 to vector<8x128xf32>
    %221 = arith.addf %220, %219 : vector<8x128xf32>
    %222 = arith.divf %220, %221 : vector<8x128xf32>
    %223 = vector.extract_strided_slice %216 {offsets = [0, 128], sizes = [8, 128], strides = [1, 1]} : vector<8x512xf32> to vector<8x128xf32>
    %224 = arith.negf %223 : vector<8x128xf32>
    %225 = math.exp %224 : vector<8x128xf32>
    %cst_66 = arith.constant 1.000000e+00 : f32
    %226 = vector.broadcast %cst_66 : f32 to vector<8x128xf32>
    %227 = arith.addf %226, %225 : vector<8x128xf32>
    %228 = arith.divf %226, %227 : vector<8x128xf32>
    %229 = vector.extract_strided_slice %216 {offsets = [0, 256], sizes = [8, 128], strides = [1, 1]} : vector<8x512xf32> to vector<8x128xf32>
    %230 = math.tanh %229 : vector<8x128xf32>
    %231 = vector.extract_strided_slice %216 {offsets = [0, 384], sizes = [8, 128], strides = [1, 1]} : vector<8x512xf32> to vector<8x128xf32>
    %232 = arith.negf %231 : vector<8x128xf32>
    %233 = math.exp %232 : vector<8x128xf32>
    %cst_67 = arith.constant 1.000000e+00 : f32
    %234 = vector.broadcast %cst_67 : f32 to vector<8x128xf32>
    %235 = arith.addf %234, %233 : vector<8x128xf32>
    %236 = arith.divf %234, %235 : vector<8x128xf32>
    %237 = arith.mulf %228, %205 : vector<8x128xf32>
    %238 = arith.mulf %222, %230 : vector<8x128xf32>
    %239 = arith.addf %237, %238 : vector<8x128xf32>
    %240 = math.tanh %239 : vector<8x128xf32>
    %241 = arith.mulf %236, %240 : vector<8x128xf32>
    %c6_68 = arith.constant 6 : index
    %c0_69 = arith.constant 0 : index
    %c0_70 = arith.constant 0 : index
    %242 = vector.load %arg6[%c6_68, %c0_69, %c0_70] : memref<8x8x128xf32, #tpu.memory_space<vmem>>, vector<1x8x128xf32>
    %243 = vector.shape_cast %242 : vector<1x8x128xf32> to vector<8x128xf32>
    %244 = vector.shape_cast %241 : vector<8x128xf32> to vector<1x8x128xf32>
    tpu.vector_store %arg6[%c6_68, %c0_69, %c0_70], %244 {strides = array<i32>} : memref<8x8x128xf32, #tpu.memory_space<vmem>>, vector<1x8x128xf32>,
    %c7 = arith.constant 7 : index
    %c0_71 = arith.constant 0 : index
    %c0_72 = arith.constant 0 : index
    %245 = vector.load %arg1[%c7, %c0_71, %c0_72] : memref<8x8x128xf32, #tpu.memory_space<vmem>>, vector<1x8x128xf32>
    %246 = vector.shape_cast %245 : vector<1x8x128xf32> to vector<8x128xf32>
    %247 = tpu.concatenate %246, %241 in 1 : vector<8x128xf32>, vector<8x128xf32> -> vector<8x256xf32>
    %cst_73 = arith.constant dense<0.000000e+00> : vector<8x512xf32>
    %248 = tpu.matmul %247, %3, %cst_73 {dimension_numbers = #tpu.dot_dimension_numbers<[1], [0], [0], [1], [0, 0, 1, 1], [], []>} : vector<8x256xf32>, vector<256x512xf32>, vector<8x512xf32> -> vector<8x512xf32>
    %249 = vector.broadcast %4 : vector<1x512xf32> to vector<8x512xf32>
    %250 = arith.addf %248, %249 : vector<8x512xf32>
    %251 = vector.extract_strided_slice %250 {offsets = [0, 0], sizes = [8, 128], strides = [1, 1]} : vector<8x512xf32> to vector<8x128xf32>
    %252 = arith.negf %251 : vector<8x128xf32>
    %253 = math.exp %252 : vector<8x128xf32>
    %cst_74 = arith.constant 1.000000e+00 : f32
    %254 = vector.broadcast %cst_74 : f32 to vector<8x128xf32>
    %255 = arith.addf %254, %253 : vector<8x128xf32>
    %256 = arith.divf %254, %255 : vector<8x128xf32>
    %257 = vector.extract_strided_slice %250 {offsets = [0, 128], sizes = [8, 128], strides = [1, 1]} : vector<8x512xf32> to vector<8x128xf32>
    %258 = arith.negf %257 : vector<8x128xf32>
    %259 = math.exp %258 : vector<8x128xf32>
    %cst_75 = arith.constant 1.000000e+00 : f32
    %260 = vector.broadcast %cst_75 : f32 to vector<8x128xf32>
    %261 = arith.addf %260, %259 : vector<8x128xf32>
    %262 = arith.divf %260, %261 : vector<8x128xf32>
    %263 = vector.extract_strided_slice %250 {offsets = [0, 256], sizes = [8, 128], strides = [1, 1]} : vector<8x512xf32> to vector<8x128xf32>
    %264 = math.tanh %263 : vector<8x128xf32>
    %265 = vector.extract_strided_slice %250 {offsets = [0, 384], sizes = [8, 128], strides = [1, 1]} : vector<8x512xf32> to vector<8x128xf32>
    %266 = arith.negf %265 : vector<8x128xf32>
    %267 = math.exp %266 : vector<8x128xf32>
    %cst_76 = arith.constant 1.000000e+00 : f32
    %268 = vector.broadcast %cst_76 : f32 to vector<8x128xf32>
    %269 = arith.addf %268, %267 : vector<8x128xf32>
    %270 = arith.divf %268, %269 : vector<8x128xf32>
    %271 = arith.mulf %262, %239 : vector<8x128xf32>
    %272 = arith.mulf %256, %264 : vector<8x128xf32>
    %273 = arith.addf %271, %272 : vector<8x128xf32>
    %274 = math.tanh %273 : vector<8x128xf32>
    %275 = arith.mulf %270, %274 : vector<8x128xf32>
    %c7_77 = arith.constant 7 : index
    %c0_78 = arith.constant 0 : index
    %c0_79 = arith.constant 0 : index
    %276 = vector.load %arg6[%c7_77, %c0_78, %c0_79] : memref<8x8x128xf32, #tpu.memory_space<vmem>>, vector<1x8x128xf32>
    %277 = vector.shape_cast %276 : vector<1x8x128xf32> to vector<8x128xf32>
    %278 = vector.shape_cast %275 : vector<8x128xf32> to vector<1x8x128xf32>
    tpu.vector_store %arg6[%c7_77, %c0_78, %c0_79], %278 {strides = array<i32>} : memref<8x8x128xf32, #tpu.memory_space<vmem>>, vector<1x8x128xf32>,
    %c0_80 = arith.constant 0 : index
    %c0_81 = arith.constant 0 : index
    %279 = vector.load %arg7[%c0_80, %c0_81] : memref<8x128xf32, #tpu.memory_space<vmem>>, vector<8x128xf32>
    tpu.vector_store %arg7[%c0_80, %c0_81], %275 {strides = array<i32>} : memref<8x128xf32, #tpu.memory_space<vmem>>, vector<8x128xf32>,
    %c0_82 = arith.constant 0 : index
    %c0_83 = arith.constant 0 : index
    %280 = vector.load %arg8[%c0_82, %c0_83] : memref<8x128xf32, #tpu.memory_space<vmem>>, vector<8x128xf32>
    tpu.vector_store %arg8[%c0_82, %c0_83], %273 {strides = array<i32>} : memref<8x128xf32, #tpu.memory_space<vmem>>, vector<8x128xf32>,
    return
  }
  func.func @transform_0(%arg0: i32) -> (i32, i32, i32) {
    %c0_i32 = arith.constant 0 : i32
    %c0_i32_0 = arith.constant 0 : i32
    %c0_i32_1 = arith.constant 0 : i32
    return %arg0, %c0_i32, %c0_i32_0 : i32, i32, i32
  }
  func.func @transform_1(%arg0: i32) -> (i32, i32) {
    %c0_i32 = arith.constant 0 : i32
    %c0_i32_0 = arith.constant 0 : i32
    %c0_i32_1 = arith.constant 0 : i32
    return %c0_i32, %c0_i32_0 : i32, i32
  }
  func.func @transform_2(%arg0: i32) -> (i32, i32) {
    %c0_i32 = arith.constant 0 : i32
    %c0_i32_0 = arith.constant 0 : i32
    %c0_i32_1 = arith.constant 0 : i32
    return %c0_i32, %c0_i32_0 : i32, i32
  }
  func.func @transform_3(%arg0: i32) -> (i32, i32) {
    %c0_i32 = arith.constant 0 : i32
    %c0_i32_0 = arith.constant 0 : i32
    %c0_i32_1 = arith.constant 0 : i32
    return %c0_i32, %c0_i32_0 : i32, i32
  }
  func.func @transform_4(%arg0: i32) -> (i32, i32) {
    %c0_i32 = arith.constant 0 : i32
    %c0_i32_0 = arith.constant 0 : i32
    %c0_i32_1 = arith.constant 0 : i32
    return %c0_i32, %c0_i32_0 : i32, i32
  }
  func.func @transform_5(%arg0: i32) -> (i32, i32, i32) {
    %c0_i32 = arith.constant 0 : i32
    %c0_i32_0 = arith.constant 0 : i32
    %c0_i32_1 = arith.constant 0 : i32
    return %arg0, %c0_i32, %c0_i32_0 : i32, i32, i32
  }
  func.func @transform_6(%arg0: i32) -> (i32, i32) {
    %c0_i32 = arith.constant 0 : i32
    %c0_i32_0 = arith.constant 0 : i32
    %c0_i32_1 = arith.constant 0 : i32
    return %c0_i32, %c0_i32_0 : i32, i32
  }
  func.func @transform_7(%arg0: i32) -> (i32, i32) {
    %c0_i32 = arith.constant 0 : i32
    %c0_i32_0 = arith.constant 0 : i32
    %c0_i32_1 = arith.constant 0 : i32
    return %c0_i32, %c0_i32_0 : i32, i32
  }
}

</mosaic_0001>

<bundles_post_ra>
// kernel: tpu_custom_call.1
= control target key start
LH: loop header
LB: loop body
LE: loop exit
PB: predicated region body
PF: predicated region fallthrough
CT: control target
= control target key end

     0   :  { %13 = vsyncpa [#allocation3], 0  ;;  %s4734_s0 = inlined_call_operand.hbm [shape: f32[16,8,128], index: 0, kind: input, shape index: {}]   ;;  %s4735_s1 = inlined_call_operand.hbm [shape: f32[8,128], index: 1, kind: input, shape index: {}]   ;;  %s4736_s2 = inlined_call_operand.hbm [shape: f32[8,128], index: 2, kind: input, shape index: {}]   ;;  %s4737_s3 = inlined_call_operand.hbm [shape: f32[256,512], index: 3, kind: input, shape index: {}]   ;;  %s4738_s4 = inlined_call_operand.hbm [shape: f32[1,512], index: 4, kind: input, shape index: {}]   ;;  %s4739_s5 = inlined_call_operand.hbm [shape: f32[16,8,128], index: 5, kind: output, shape index: {0}]   ;;  %s4740_s6 = inlined_call_operand.hbm [shape: f32[8,128], index: 6, kind: output, shape index: {1}]   ;;  %s4741_s7 = inlined_call_operand.hbm [shape: f32[8,128], index: 7, kind: output, shape index: {2}]  }
   0x1   :  { %15 = vsyncpa [#allocation3 + $0x1], 0 }
   0x2   :  { %16 = vsyncpa [#allocation6], 0 }
   0x3   :  { %17 = vsyncpa [#allocation9], 0 }
   0x4   :  { %18 = vsyncpa [#allocation4], 0 }
   0x5   :  { %20 = vsyncpa [#allocation4 + $0x1], 0 }
   0x6   :  { %21 = vsyncpa [#allocation13], 0  ;;  %s3689_s24 = smov 0   ;;  %s3691_s25 = smov 0  }
   0x7   :  { %s3693_s26 = smov 0   ;;  %s3695_s27 = smov 0  }
   0x8 LB: > { %s3710_s28 = sadd.s32 4294967295, %s3633_s27   ;;  %s2035_s29 = sadd.s32 4294967294, %s3633_s27   ;;  %s3633_s27 = sphi %s3695_s27, %s4973_s27   ;;  %s3629_s26 = sphi %s3693_s26, %s4972_s26   ;;  %s3625_s25 = sphi %s3691_s25, %s4971_s25   ;;  %s3621_s24 = sphi %s3689_s24, %s4970_s24  }
   0x9   : > { %p47_p0 = scmp.ne.s32.totalorder %s3625_s25, %s3621_s24  ;;  %p4742_p1 = scmp.eq.s32.totalorder %s3710_s28, 0 }
   0xa   : > { %p161_p3 = scmp.eq.s32.totalorder %s2035_s29, 1  ;;  %p2036_p5 = scmp.ge.s32.totalorder %s3633_s27, 1 }
   0xb   : > { %p3719_p4 = por %p4742_p1, %p47_p0  ;;  %p210_p7 = scmp.lt.s32.totalorder %s3633_s27, 3 }
   0xc   : > { %p3724_p6 = por %p161_p3, %p47_p0  ;;  %s3635_s10 = smov [#allocation5]  }
   0xd   : > { %s4794_s30 = scalar_select %p3719_p4, 1, 0 }
   0xe   : > { %s4795_s8 = scalar_select %p3724_p6, 1, 0 }
   0xf   : > { %p3730_p9 = pnand %p2036_p5, %p210_p7  ;;  %s223_s11 = sshll.u32 %s3635_s10, 4  ;;  %s224_s11 = int_to_ptr.vmem [resolvable:$true] %s223_s11 }
  0x10   : > { %s3636_s12 = smov [#allocation8]   ;;  %s3637_s15 = smov [#allocation7]  }
  0x11   : > { %s4796_s9 = scalar_select %p3730_p9, 1, 0 }
  0x12   : > { %p3154_p11 = pneg %p3730_p9  ;;  %s244_s13 = sshll.u32 %s3636_s12, 4  ;;  %s3743_s13 = int_to_ptr.vmem [resolvable:$true] %s244_s13 }
  0x13   : > { %s3745_s16 = sshll.u32 %s3637_s15, 4  ;;  %s3361_s19 = scalar_lea.hbm %s4735_s1, 128  ;;  %s235_s16 = int_to_ptr.vmem [resolvable:$true] %s3745_s16 }
  0x14   : > { %p3739_p12 = pnand %p3154_p11, %p4742_p1  ;;  %p3362_p13 = scmp.ne.s32.totalorder %s4735_s1, %s3361_s19 }
  0x15   : > { %p3368_p7 = scmp.lt.u32.totalorder %s3361_s19, %s4735_s1 }
  0x16   : > { %p3755_p0 = pneg %p3739_p12 }
  0x18   : > { %p3364_p3 = pnand %p3755_p0, %p3362_p13 }
  0x1a   : > { %p3365_p5 = pneg %p3364_p3 }
  0x1c   : > { %p3370_p11 = pnand %p3368_p7, %p3365_p5 }
  0x1e   : > { %3373 = shalt.err (!%p3370_p11)
}
  0x1f   : > { %s3374_s10 = scalar_lea.vmem %s224_s11, 128  ;;  %p3382_p2 = scmp.lt.s32.totalorder %s224_s11, %s224_s11 }
  0x20   : > { %p3375_p10 = scmp.ne.s32.totalorder %s224_s11, %s3374_s10  ;;  %p3383_p6 = scmp.lt.s32.totalorder %s3374_s10, %s3374_s10 }
  0x22   : > { %p3377_p8 = pnand %p3375_p10, %p3755_p0  ;;  %p3384_p4 = por %p3383_p6, %p3382_p2 }
  0x24   : > { %p3378_p1 = pneg %p3377_p8 }
  0x26   : > { %p3385_p9 = pnand %p3384_p4, %p3378_p1 }
  0x28   : > { %3388 = shalt.err (!%p3385_p9)
}
  0x29   : > { %3157 = dma.hbm_to_vmem [thread:$0]  (!%p3739_p12), %s4735_s1, 128, %s224_s11, [#allocation6]  }
  0x2a   : > { %s3389_s19 = scalar_lea.hbm %s4737_s3, 16384 }
  0x2b   : > { %p3390_p8 = scmp.ne.s32.totalorder %s4737_s3, %s3389_s19  ;;  %p3396_p1 = scmp.lt.u32.totalorder %s3389_s19, %s4737_s3 }
  0x2d   : > { %p3392_p10 = pnand %p3390_p8, %p3755_p0 }
  0x2f   : > { %p3393_p2 = pneg %p3392_p10 }
  0x31   : > { %p3398_p4 = pnand %p3396_p1, %p3393_p2 }
  0x33   : > { %3401 = shalt.err (!%p3398_p4)
}
  0x34   : > { %s3402_s11 = scalar_lea.vmem %s3743_s13, 16384  ;;  %p3410_p3 = scmp.lt.s32.totalorder %s3743_s13, %s3743_s13 }
  0x35   : > { %p3403_p6 = scmp.ne.s32.totalorder %s3743_s13, %s3402_s11  ;;  %p3411_p5 = scmp.lt.s32.totalorder %s3402_s11, %s3402_s11 }
  0x37   : > { %p3405_p9 = pnand %p3403_p6, %p3755_p0  ;;  %p3412_p7 = por %p3411_p5, %p3410_p3 }
  0x39   : > { %p3406_p13 = pneg %p3405_p9 }
  0x3b   : > { %p3413_p11 = pnand %p3412_p7, %p3406_p13 }
  0x3d   : > { %3416 = shalt.err (!%p3413_p11)
}
  0x3e   : > { %s3638_s10 = smov 512   ;;  %s3639_s12 = smov 32  }
  0x3f   : > { %3163 = dma.hbm_to_vmem [thread:$0]  (!%p3739_p12), %s4737_s3, 16384, %s3743_s13, [#allocation9], %s3638_s10, %s3638_s10, %s3639_s12  }
  0x40   : > { %s3417_s20 = scalar_lea.hbm %s4736_s2, 128 }
  0x41   : > { %p3418_p8 = scmp.ne.s32.totalorder %s4736_s2, %s3417_s20  ;;  %p3424_p1 = scmp.lt.u32.totalorder %s3417_s20, %s4736_s2 }
  0x43   : > { %p3420_p10 = pnand %p3418_p8, %p3755_p0 }
  0x45   : > { %p3421_p2 = pneg %p3420_p10 }
  0x47   : > { %p3426_p4 = pnand %p3424_p1, %p3421_p2 }
  0x49   : > { %3429 = shalt.err (!%p3426_p4)
}
  0x4a   : > { %s3430_s15 = scalar_lea.vmem %s235_s16, 128  ;;  %p3438_p3 = scmp.lt.s32.totalorder %s235_s16, %s235_s16 }
  0x4b   : > { %p3431_p6 = scmp.ne.s32.totalorder %s235_s16, %s3430_s15  ;;  %p3439_p5 = scmp.lt.s32.totalorder %s3430_s15, %s3430_s15 }
  0x4d   : > { %p3433_p9 = pnand %p3431_p6, %p3755_p0  ;;  %p3440_p7 = por %p3439_p5, %p3438_p3 }
  0x4f   : > { %p3434_p13 = pneg %p3433_p9 }
  0x51   : > { %p3441_p11 = pnand %p3440_p7, %p3434_p13 }
  0x53   : > { %3444 = shalt.err (!%p3441_p11)
}
  0x54   : > { %3160 = dma.hbm_to_vmem [thread:$0]  (!%p3739_p12), %s4736_s2, 128, %s235_s16, [#allocation6]  }
  0x55   : > { %s3640_s12 = smov [#allocation10]   ;;  %s3445_s20 = scalar_lea.hbm %s4738_s4, 64 }
  0x56   : > { %s258_s17 = sshll.u32 %s3640_s12, 4  ;;  %p3446_p8 = scmp.ne.s32.totalorder %s4738_s4, %s3445_s20  ;;  %s259_s17 = int_to_ptr.vmem [resolvable:$true] %s258_s17 }
  0x57   : > { %p3452_p1 = scmp.lt.u32.totalorder %s3445_s20, %s4738_s4 }
  0x58   : > { %p3448_p10 = pnand %p3446_p8, %p3755_p0 }
  0x5a   : > { %p3449_p2 = pneg %p3448_p10 }
  0x5c   : > { %p3454_p4 = pnand %p3452_p1, %p3449_p2 }
  0x5e   : > { %3457 = shalt.err (!%p3454_p4)
}
  0x5f   : > { %s3458_s16 = scalar_lea.vmem %s259_s17, 64  ;;  %p3466_p3 = scmp.lt.s32.totalorder %s259_s17, %s259_s17 }
  0x60   : > { %p3459_p6 = scmp.ne.s32.totalorder %s259_s17, %s3458_s16  ;;  %p3467_p5 = scmp.lt.s32.totalorder %s3458_s16, %s3458_s16 }
  0x62   : > { %p3461_p9 = pnand %p3459_p6, %p3755_p0  ;;  %p3468_p7 = por %p3467_p5, %p3466_p3 }
  0x64   : > { %p3462_p13 = pneg %p3461_p9 }
  0x66   : > { %p3469_p11 = pnand %p3468_p7, %p3462_p13 }
  0x68   : > { %3472 = shalt.err (!%p3469_p11)
}
  0x69   : > { %3166 = dma.hbm_to_vmem [thread:$0]  (!%p3739_p12), %s4738_s4, 64, %s259_s17, [#allocation9]  }
  0x6a   : > { %s3832_s22 = sadd.s32 1, %s3633_s27   ;;  %s34_s10 = sadd.s32 1, %s3629_s26 }
  0x6b   : > { %s31_s14 = ssub.s32 %s3633_s27, %s3832_s22  ;;  %p41_p0 = scmp.ne.s32.totalorder %s3629_s26, %s3625_s25 }
  0x6c   : > { %p32_p8 = scmp.eq.s32.totalorder %s31_s14, 0  ;;  %p42_p10 = scmp.eq.s32.totalorder %s3633_s27, 0 }
  0x6d   : > { %p4799_p2 = scmp.eq.s32.totalorder %s3710_s28, 1  ;;  %p3179_p4 = scmp.lt.s32.totalorder %s3633_s27, 2 }
  0x6e   : > { %s3848_s18 = scalar_select %p32_p8, %s3629_s26, %s34_s10  }
  0x6f   : > { %p3842_p1 = por %p4799_p2, %p41_p0  ;;  %p43_p6 = por %p42_p10, %p41_p0 }
  0x70   : > { %s269_s19 = sand.u32 1, %s3629_s26   ;;  %s2100_s17 = sshll.u32 %s3633_s27, 10 }
  0x71   : > { %s2042_s20 = sshll.u32 %s269_s19, 6  ;;  %s3855_s29 = scalar_lea.hbm %s4734_s0, %s2100_s17 }
  0x72   : > { %s273_s11 = scalar_lea.vmem [#allocation2], %s2042_s20  ;;  %p3859_p12 = pnand %p3179_p4, %p43_p6 }
  0x73   : > { %s280_s16 = sshll.u32 %s273_s11, 4  ;;  %s3863_s13 = scalar_lea.sflag [#allocation3], %s269_s19  ;;  %s3857_s16 = int_to_ptr.vmem [resolvable:$true] %s280_s16 }
  0x74   : > { %s3473_s10 = scalar_lea.hbm %s3855_s29, 1024  ;;  %p3475_p13 = pneg %p3859_p12 }
  0x75   : > { %p3474_p9 = scmp.ne.s32.totalorder %s3855_s29, %s3473_s10  ;;  %s3478_s17 = scalar_lea.hbm %s4734_s0, 2048 }
  0x76   : > { %p3479_p7 = scmp.lt.u32.totalorder %s3855_s29, %s4734_s0  ;;  %p3480_p11 = scmp.lt.u32.totalorder %s3478_s17, %s3473_s10 }
  0x77   : > { %p3476_p3 = pnand %p3475_p13, %p3474_p9  ;;  %p3482_p8 = scmp.lt.u32.totalorder %s3473_s10, %s3855_s29 }
  0x78   : > { %p3481_p0 = por %p3480_p11, %p3479_p7 }
  0x79   : > { %p3477_p5 = pneg %p3476_p3 }
  0x7a   : > { %p3483_p10 = por %p3482_p8, %p3481_p0 }
  0x7c   : > { %p3484_p2 = pnand %p3483_p10, %p3477_p5 }
  0x7e   : > { %3487 = shalt.err (!%p3484_p2)
}
  0x7f   : > { %s3488_s19 = scalar_lea.vmem %s3857_s16, 1024  ;;  %s3641_s11 = smov [#allocation2]  }
  0x80   : > { %p3489_p4 = scmp.ne.s32.totalorder %s3857_s16, %s3488_s19  ;;  %s3493_s14 = sshll.u32 %s3641_s11, 4  ;;  %s3494_s14 = int_to_ptr.vmem [resolvable:$false] %s3493_s14 }
  0x81   : > { %s3495_s20 = scalar_lea.vmem %s3494_s14, 2048  ;;  %p3496_p3 = scmp.lt.s32.totalorder %s3857_s16, %s3494_s14 }
  0x82   : > { %p3491_p6 = pnand %p3489_p4, %p3475_p13  ;;  %p3497_p7 = scmp.lt.s32.totalorder %s3495_s20, %s3488_s19 }
  0x84   : > { %p3492_p9 = pneg %p3491_p6  ;;  %p3498_p11 = por %p3497_p7, %p3496_p3 }
  0x86   : > { %p3499_p0 = pnand %p3498_p11, %p3492_p9 }
  0x88   : > { %3502 = shalt.err (!%p3499_p0)
}
  0x89   : > { %s3642_s10 = smov 128   ;;  %s3643_s17 = smov 8  }
  0x8a   : > { %3170 = dma.hbm_to_vmem [thread:$0]  (!%p3859_p12), %s3855_s29, 1024, %s3857_s16, %s3863_s13, %s3642_s10, %s3642_s10, %s3643_s17  }
  0x8b   : > { %p4802_p13 = scmp.ne.s32.totalorder %s4796_s9, 0 }
  0x8d   : > { %292 = sbr.rel (%p4802_p13) target bundleno = 2371 (0x943), region = 40 }
  0x94   : > { %s3894_s21 = sand.u32 1, %s3625_s25   ;;  %p4803_p5 = scmp.ne.s32.totalorder %s4794_s30, 0 }
  0x95   : > { %s2046_s23 = sshll.u32 %s3894_s21, 6  ;;  %s295_s19 = scalar_lea.sflag [#allocation3], %s3894_s21 }
  0x96   : > { %s3898_s11 = scalar_lea.vmem [#allocation2], %s2046_s23 }
  0x97   : > { %3600 = dma.done.wait (%p4803_p5), %s295_s19, 1024  }
  0x98   : > { %3602 = vsyncadd (%p4803_p5), %s295_s19, 4294966272  ;;  %p4804_p12 = scmp.eq.s32.totalorder %s3710_s28, 0 }
  0x9a   : > { %3604 = dma.done.wait (%p4804_p12), [#allocation6], 256   ;;  %p4805_p8 = pmov %p4804_p12 }
  0x9c   : > { %3606 = vsyncadd (%p4805_p8), [#allocation6], 4294967040  ;;  %p4806_p10 = pmov %p4805_p8 }
  0x9d   : > { %p4807_p2 = pmov %p4805_p8 }
  0x9e   : > { %3608 = dma.done.wait (%p4806_p10), [#allocation9], 16448  }
  0x9f   : > { %3610 = vsyncadd (%p4807_p2), [#allocation9], 4294950848  ;;  %s3912_s9 = scalar_lea.vmem [#allocation11], %s2046_s23  ;;  %p4808_p4 = scmp.ne.s32.totalorder %s3710_s28, 0 }
  0xa0   : > { %v351_v0 = vld [vmem:[#allocation5] sm:$0xff] (!%p4808_p4)  ;;  %v353_v1 = vld [vmem:[#allocation7] sm:$0xff] (!%p4808_p4) }
  0xa1   : > { %350 = sbr.rel (%p4808_p4) target bundleno = 168 (0xa8), region = 64  ;;  %352 = vst [vmem:[#allocation12] sm:$0xff] (!%p4808_p4), %v351_v0  ;;  %354 = vst [vmem:[#allocation14] sm:$0xff] (!%p4808_p4), %v353_v1 }
  0xa8 PF: > { %v356_v2 = vld [vmem:[#allocation8 + $0x8] sm:$0xff]  ;;  %v355_v4 = vld [vmem:[#allocation8] sm:$0xff]  ;;  %v358_v20 = vld [vmem:[#allocation8 + $0x18] sm:$0xff]  ;;  %s3644_s30 = smov [#allocation12]   ;;  %s2101_s16 = sshll.u32 %s3710_s28, 10 }
  0xa9   : > { %v360_v3 = vld [vmem:[#allocation8 + $0x28] sm:$0xff]  ;;  %v359_v6 = vld [vmem:[#allocation8 + $0x20] sm:$0xff]  ;;  %v362_v21 = vld [vmem:[#allocation8 + $0x38] sm:$0xff]  ;;  %s1895_s29 = sshll.u32 %s3644_s30, 4  ;;  %s1881_s15 = sshll.u32 %s3912_s9, 4  ;;  %s1896_s29 = int_to_ptr.vmem [resolvable:$true] %s1895_s29  ;;  %s4642_s15 = int_to_ptr.vmem [resolvable:$true] %s1881_s15 }
  0xaa   : > { %v3916_v5 = vpack.c.bf16 %v360_v3, %v356_v2  ;;  %v364_v7 = vld [vmem:[#allocation8 + $0x48] sm:$0xff]  ;;  %v3918_v9 = vpack.c.bf16 %v359_v6, %v355_v4  ;;  %v363_v11 = vld [vmem:[#allocation8 + $0x40] sm:$0xff]  ;;  %v3929_v23 = vpack.c.bf16 %v362_v21, %v358_v20  ;;  %v357_v24 = vld [vmem:[#allocation8 + $0x10] sm:$0xff]  ;;  %s3645_s13 = smov [#allocation14]   ;;  %s4640_s17 = scalar_lea.hbm %s4739_s5, %s2101_s16 }
  0xab   : > { %v368_v8 = vld [vmem:[#allocation8 + $0x68] sm:$0xff]  ;;  %v367_v12 = vld [vmem:[#allocation8 + $0x60] sm:$0xff]  ;;  %v361_v25 = vld [vmem:[#allocation8 + $0x30] sm:$0xff]  ;;  %s1906_s14 = sshll.u32 %s3645_s13, 4  ;;  %s3503_s23 = scalar_lea.vmem %s1896_s29, 128  ;;  %s4645_s14 = int_to_ptr.vmem [resolvable:$true] %s1906_s14 }
  0xac   : > { %4809 = vst [vmem:[#allocation20_spill] sm:$0xff] %v3916_v5  ;;  %v3920_v10 = vpack.c.bf16 %v368_v8, %v364_v7  ;;  %v372_v13 = vld [vmem:[#allocation8 + $0x88] sm:$0xff]  ;;  %2103 = vmatprep.subr.bf16.mxu0 %v3916_v5  ;;  %v3924_v15 = vpack.c.bf16 %v367_v12, %v363_v11  ;;  %v371_v16 = vld [vmem:[#allocation8 + $0x80] sm:$0xff]  ;;  %4810 = vst [vmem:[#allocation21_spill] sm:$0xff] %v3929_v23  ;;  %v3931_v26 = vpack.c.bf16 %v361_v25, %v357_v24  ;;  %p3504_p6 = scmp.ne.s32.totalorder %s1896_s29, %s3503_s23  ;;  %p4960_p9 = scmp.eq.s32.totalorder %s3710_s28, 1 }
  0xad   : > { %v376_v14 = vld [vmem:[#allocation8 + $0xa8] sm:$0xff]  ;;  %2105 = vmatpush1.bf16.msra.mxu0 %v3918_v9  ;;  %v375_v17 = vld [vmem:[#allocation8 + $0xa0] sm:$0xff]  ;;  %2167 = vmatprep.subr.bf16.mxu1 %v3929_v23  ;;  %v366_v28 = vld [vmem:[#allocation8 + $0x58] sm:$0xff]  ;;  %p3510_p11 = scmp.lt.s32.totalorder %s1896_s29, %s1896_s29  ;;  %p3511_p0 = scmp.lt.s32.totalorder %s3503_s23, %s3503_s23 }
  0xae   : > { %2107 = vmatprep.subr.bf16.mxu0 %v3920_v10  ;;  %v3927_v18 = vpack.c.bf16 %v376_v14, %v372_v13  ;;  %v380_v19 = vld [vmem:[#allocation8 + $0xc8] sm:$0xff]  ;;  %v3934_v27 = vpack.c.bf16 %v375_v17, %v371_v16  ;;  %v370_v29 = vld [vmem:[#allocation8 + $0x78] sm:$0xff]  ;;  %v365_v30 = vld [vmem:[#allocation8 + $0x50] sm:$0xff]  ;;  %2169 = vmatpush1.bf16.msra.mxu1 %v3931_v26  ;;  %p3505_p3 = pnand %p3504_p6, %p4960_p9 }
  0xaf   : > { %v384_v22 = vld [vmem:[#allocation8 + $0xe8] sm:$0xff]  ;;  %v379_v32 = vld [vmem:[#allocation8 + $0xc0] sm:$0xff]  ;;  %v3941_v34 = vpack.c.bf16 %v370_v29, %v366_v28  ;;  %v369_v35 = vld [vmem:[#allocation8 + $0x70] sm:$0xff]  ;;  %p3512_p13 = por %p3511_p0, %p3510_p11 }
  0xb0   : > { %v3938_v31 = vpack.c.bf16 %v384_v22, %v380_v19  ;;  %v383_v33 = vld [vmem:[#allocation8 + $0xe0] sm:$0xff]  ;;  %v388_v36 = vld [vmem:[#allocation8 + $0x108] sm:$0xff]  ;;  %v3943_v38 = vpack.c.bf16 %v369_v35, %v365_v30  ;;  %v374_v39 = vld [vmem:[#allocation8 + $0x98] sm:$0xff]  ;;  %p3506_p7 = pneg %p3505_p3 }
  0xb1   : > { %2109 = vmatpush1.bf16.msra.mxu0 %v3924_v15  ;;  %v392_v37 = vld [vmem:[#allocation8 + $0x128] sm:$0xff]  ;;  %2171 = vmatprep.subr.bf16.mxu1 %v3941_v34  ;;  %v378_v40 = vld [vmem:[#allocation8 + $0xb8] sm:$0xff]  ;;  %v373_v41 = vld [vmem:[#allocation8 + $0x90] sm:$0xff]  ;;  %v3947_v43 = vpack.c.bf16 %v383_v33, %v379_v32 }
  0xb2   : > { %2111 = vmatprep.subr.bf16.mxu0 %v3927_v18  ;;  %v377_v42 = vld [vmem:[#allocation8 + $0xb0] sm:$0xff]  ;;  %v387_v44 = vld [vmem:[#allocation8 + $0x100] sm:$0xff]  ;;  %v3949_v46 = vpack.c.bf16 %v378_v40, %v374_v39  ;;  %v3952_v47 = vpack.c.bf16 %v392_v37, %v388_v36  ;;  %2173 = vmatpush1.bf16.msra.mxu1 %v3943_v38  ;;  %v396_v48 = vld [vmem:[#allocation8 + $0x148] sm:$0xff]  ;;  %p3513_p5 = pnand %p3512_p13, %p3506_p7 }
  0xb3   : > { %v391_v45 = vld [vmem:[#allocation8 + $0x120] sm:$0xff]  ;;  %v3955_v49 = vpack.c.bf16 %v377_v42, %v373_v41  ;;  %v382_v50 = vld [vmem:[#allocation8 + $0xd8] sm:$0xff]  ;;  %v400_v52 = vld [vmem:[#allocation8 + $0x168] sm:$0xff] }
  0xb4   : > { %v386_v51 = vld [vmem:[#allocation8 + $0xf8] sm:$0xff]  ;;  %2175 = vmatprep.subr.bf16.mxu1 %v3949_v46  ;;  %v381_v54 = vld [vmem:[#allocation8 + $0xd0] sm:$0xff]  ;;  %v3961_v56 = vpack.c.bf16 %v391_v45, %v387_v44  ;;  %v3964_v59 = vpack.c.bf16 %v400_v52, %v396_v48  ;;  %v395_v60 = vld [vmem:[#allocation8 + $0x140] sm:$0xff] }
  0xb5   : > { %2113 = vmatpush1.bf16.msra.mxu0 %v3934_v27  ;;  %v3958_v53 = vpack.c.bf16 %v386_v51, %v382_v50  ;;  %v385_v55 = vld [vmem:[#allocation8 + $0xf0] sm:$0xff]  ;;  %v390_v57 = vld [vmem:[#allocation8 + $0x118] sm:$0xff]  ;;  %v399_v61 = vld [vmem:[#allocation8 + $0x160] sm:$0xff] }
  0xb6   : > { %2115 = vmatprep.subr.bf16.mxu0 %v3938_v31  ;;  %v394_v58 = vld [vmem:[#allocation8 + $0x138] sm:$0xff]  ;;  %2177 = vmatpush1.bf16.msra.mxu1 %v3955_v49  ;;  %v404_v62 = vld [vmem:[#allocation8 + $0x188] sm:$0xff]  ;;  %v3967_v63 = vpack.c.bf16 %v385_v55, %v381_v54  ;;  %v389_v2 = vld [vmem:[#allocation8 + $0x110] sm:$0xff]  ;;  %v3973_v7 = vpack.c.bf16 %v399_v61, %v395_v60 }
  0xb7   : > { %v408_v0 = vld [vmem:[#allocation8 + $0x1a8] sm:$0xff]  ;;  %2179 = vmatprep.subr.bf16.mxu1 %v3958_v53  ;;  %v3970_v1 = vpack.c.bf16 %v394_v58, %v390_v57  ;;  %v393_v3 = vld [vmem:[#allocation8 + $0x130] sm:$0xff]  ;;  %v398_v4 = vld [vmem:[#allocation8 + $0x158] sm:$0xff] }
  0xb8   : > { %v402_v6 = vld [vmem:[#allocation8 + $0x178] sm:$0xff]  ;;  %v3976_v8 = vpack.c.bf16 %v408_v0, %v404_v62  ;;  %v403_v11 = vld [vmem:[#allocation8 + $0x180] sm:$0xff]  ;;  %v412_v13 = vld [vmem:[#allocation8 + $0x1c8] sm:$0xff]  ;;  %v3979_v14 = vpack.c.bf16 %v393_v3, %v389_v2 }
  0xb9   : > { %2117 = vmatpush1.bf16.msra.mxu0 %v3947_v43  ;;  %v407_v12 = vld [vmem:[#allocation8 + $0x1a0] sm:$0xff]  ;;  %v416_v16 = vld [vmem:[#allocation8 + $0x1e8] sm:$0xff]  ;;  %v3982_v17 = vpack.c.bf16 %v402_v6, %v398_v4  ;;  %v397_v19 = vld [vmem:[#allocation8 + $0x150] sm:$0xff] }
  0xba   : > { %2119 = vmatprep.subr.bf16.mxu0 %v3952_v47  ;;  %2181 = vmatpush1.bf16.msra.mxu1 %v3967_v63  ;;  %v401_v20 = vld [vmem:[#allocation8 + $0x170] sm:$0xff]  ;;  %v406_v21 = vld [vmem:[#allocation8 + $0x198] sm:$0xff]  ;;  %v3985_v24 = vpack.c.bf16 %v407_v12, %v403_v11  ;;  %v3988_v25 = vpack.c.bf16 %v416_v16, %v412_v13  ;;  %v411_v28 = vld [vmem:[#allocation8 + $0x1c0] sm:$0xff] }
  0xbb   : > { %2183 = vmatprep.subr.bf16.mxu1 %v3970_v1  ;;  %v410_v22 = vld [vmem:[#allocation8 + $0x1b8] sm:$0xff]  ;;  %v415_v29 = vld [vmem:[#allocation8 + $0x1e0] sm:$0xff]  ;;  %v420_v30 = vld [vmem:[#allocation8 + $0x208] sm:$0xff]  ;;  %v3991_v32 = vpack.c.bf16 %v401_v20, %v397_v19 }
  0xbc   : > { %v424_v33 = vld [vmem:[#allocation8 + $0x228] sm:$0xff]  ;;  %v3994_v35 = vpack.c.bf16 %v410_v22, %v406_v21  ;;  %v405_v36 = vld [vmem:[#allocation8 + $0x190] sm:$0xff]  ;;  %v414_v39 = vld [vmem:[#allocation8 + $0x1d8] sm:$0xff]  ;;  %v3997_v41 = vpack.c.bf16 %v415_v29, %v411_v28 }
  0xbd   : > { %2121 = vmatpush1.bf16.msra.mxu0 %v3961_v56  ;;  %v409_v37 = vld [vmem:[#allocation8 + $0x1b0] sm:$0xff]  ;;  %v418_v40 = vld [vmem:[#allocation8 + $0x1f8] sm:$0xff]  ;;  %v4000_v42 = vpack.c.bf16 %v424_v33, %v420_v30  ;;  %v419_v44 = vld [vmem:[#allocation8 + $0x200] sm:$0xff] }
  0xbe   : > { %2123 = vmatprep.subr.bf16.mxu0 %v3964_v59  ;;  %2185 = vmatpush1.bf16.msra.mxu1 %v3979_v14  ;;  %v423_v45 = vld [vmem:[#allocation8 + $0x220] sm:$0xff]  ;;  %v428_v48 = vld [vmem:[#allocation8 + $0x248] sm:$0xff]  ;;  %v4003_v50 = vpack.c.bf16 %v409_v37, %v405_v36  ;;  %v4006_v52 = vpack.c.bf16 %v418_v40, %v414_v39  ;;  %v413_v54 = vld [vmem:[#allocation8 + $0x1d0] sm:$0xff] }
  0xbf   : > { %2187 = vmatprep.subr.bf16.mxu1 %v3982_v17  ;;  %v432_v51 = vld [vmem:[#allocation8 + $0x268] sm:$0xff]  ;;  %v417_v55 = vld [vmem:[#allocation8 + $0x1f0] sm:$0xff]  ;;  %v422_v57 = vld [vmem:[#allocation8 + $0x218] sm:$0xff]  ;;  %v4009_v60 = vpack.c.bf16 %v423_v45, %v419_v44 }
  0xc0   : > { %v426_v58 = vld [vmem:[#allocation8 + $0x238] sm:$0xff]  ;;  %v4012_v61 = vpack.c.bf16 %v432_v51, %v428_v48  ;;  %v427_v62 = vld [vmem:[#allocation8 + $0x240] sm:$0xff]  ;;  %v436_v2 = vld [vmem:[#allocation8 + $0x288] sm:$0xff]  ;;  %v4015_v3 = vpack.c.bf16 %v417_v55, %v413_v54 }
  0xc1   : > { %2125 = vmatpush1.bf16.msra.mxu0 %v3973_v7  ;;  %v431_v0 = vld [vmem:[#allocation8 + $0x260] sm:$0xff]  ;;  %v440_v4 = vld [vmem:[#allocation8 + $0x2a8] sm:$0xff]  ;;  %v4018_v6 = vpack.c.bf16 %v426_v58, %v422_v57  ;;  %v421_v11 = vld [vmem:[#allocation8 + $0x210] sm:$0xff] }
  0xc2   : > { %2127 = vmatprep.subr.bf16.mxu0 %v3976_v8  ;;  %2189 = vmatpush1.bf16.msra.mxu1 %v3991_v32  ;;  %v425_v12 = vld [vmem:[#allocation8 + $0x230] sm:$0xff]  ;;  %v430_v13 = vld [vmem:[#allocation8 + $0x258] sm:$0xff]  ;;  %v4021_v19 = vpack.c.bf16 %v431_v0, %v427_v62  ;;  %v435_v20 = vld [vmem:[#allocation8 + $0x280] sm:$0xff]  ;;  %v4024_v21 = vpack.c.bf16 %v440_v4, %v436_v2 }
  0xc3   : > { %2191 = vmatprep.subr.bf16.mxu1 %v3994_v35  ;;  %v434_v16 = vld [vmem:[#allocation8 + $0x278] sm:$0xff]  ;;  %v439_v22 = vld [vmem:[#allocation8 + $0x2a0] sm:$0xff]  ;;  %v444_v28 = vld [vmem:[#allocation8 + $0x2c8] sm:$0xff]  ;;  %v4027_v30 = vpack.c.bf16 %v425_v12, %v421_v11 }
  0xc4   : > { %v448_v29 = vld [vmem:[#allocation8 + $0x2e8] sm:$0xff]  ;;  %v4030_v33 = vpack.c.bf16 %v434_v16, %v430_v13  ;;  %v429_v36 = vld [vmem:[#allocation8 + $0x250] sm:$0xff]  ;;  %v438_v40 = vld [vmem:[#allocation8 + $0x298] sm:$0xff]  ;;  %v4033_v45 = vpack.c.bf16 %v439_v22, %v435_v20 }
  0xc5   : > { %2129 = vmatpush1.bf16.msra.mxu0 %v3985_v24  ;;  %v433_v37 = vld [vmem:[#allocation8 + $0x270] sm:$0xff]  ;;  %v484_v39 = vld [vmem:[#allocation12] sm:$0xff]  ;;  %v442_v44 = vld [vmem:[#allocation8 + $0x2b8] sm:$0xff]  ;;  %v4036_v48 = vpack.c.bf16 %v448_v29, %v444_v28 }
  0xc6   : > { %2131 = vmatprep.subr.bf16.mxu0 %v3988_v25  ;;  %2193 = vmatpush1.bf16.msra.mxu1 %v4003_v50  ;;  %v443_v51 = vld [vmem:[#allocation8 + $0x2c0] sm:$0xff]  ;;  %v452_v55 = vld [vmem:[#allocation8 + $0x308] sm:$0xff]  ;;  %v4039_v57 = vpack.c.bf16 %v433_v37, %v429_v36  ;;  %v4042_v62 = vpack.c.bf16 %v442_v44, %v438_v40  ;;  %v437_v0 = vld [vmem:[#allocation8 + $0x290] sm:$0xff] }
  0xc7   : > { %2195 = vmatprep.subr.bf16.mxu1 %v4006_v52  ;;  %572 = vmatprep.mubr.f32.mxu0 %v484_v39  ;;  %v447_v54 = vld [vmem:[#allocation8 + $0x2e0] sm:$0xff]  ;;  %v456_v58 = vld [vmem:[#allocation8 + $0x328] sm:$0xff]  ;;  %v441_v2 = vld [vmem:[#allocation8 + $0x2b0] sm:$0xff] }
  0xc8   : > { %643 = vmatprep.mubr.f32.mxu1 %v484_v39  ;;  %4811 = vst [vmem:[#allocation22_spill] sm:$0xff] %v4042_v62  ;;  %v446_v4 = vld [vmem:[#allocation8 + $0x2d8] sm:$0xff]  ;;  %v4045_v12 = vpack.c.bf16 %v447_v54, %v443_v51  ;;  %v4048_v13 = vpack.c.bf16 %v456_v58, %v452_v55  ;;  %v451_v16 = vld [vmem:[#allocation8 + $0x300] sm:$0xff]  ;;  %v460_v22 = vld [vmem:[#allocation8 + $0x348] sm:$0xff]  ;;  %v4051_v28 = vpack.c.bf16 %v441_v2, %v437_v0 }
  0xc9   : > { %2133 = vmatpush1.bf16.msra.mxu0 %v3997_v41  ;;  %v450_v11 = vld [vmem:[#allocation8 + $0x2f8] sm:$0xff]  ;;  %v455_v20 = vld [vmem:[#allocation8 + $0x320] sm:$0xff]  ;;  %v464_v29 = vld [vmem:[#allocation8 + $0x368] sm:$0xff] }
  0xca   : > { %2135 = vmatprep.subr.bf16.mxu0 %v4000_v42  ;;  %2197 = vmatpush1.bf16.msra.mxu1 %v4015_v3  ;;  %4812 = vst [vmem:[#allocation23_spill] sm:$0xff] %v4045_v12  ;;  %4813 = vst [vmem:[#allocation24_spill] sm:$0xff] %v4048_v13  ;;  %v4054_v36 = vpack.c.bf16 %v450_v11, %v446_v4  ;;  %v445_v37 = vld [vmem:[#allocation8 + $0x2d0] sm:$0xff]  ;;  %v454_v40 = vld [vmem:[#allocation8 + $0x318] sm:$0xff]  ;;  %v4057_v51 = vpack.c.bf16 %v455_v20, %v451_v16 }
  0xcb   : > { %2199 = vmatprep.subr.bf16.mxu1 %v4018_v6  ;;  %4814 = vst [vmem:[#allocation25_spill] sm:$0xff] %v4051_v28  ;;  %v449_v39 = vld [vmem:[#allocation8 + $0x2f0] sm:$0xff]  ;;  %v458_v44 = vld [vmem:[#allocation8 + $0x338] sm:$0xff]  ;;  %v4060_v54 = vpack.c.bf16 %v464_v29, %v460_v22  ;;  %v459_v55 = vld [vmem:[#allocation8 + $0x340] sm:$0xff] }
  0xcc   : > { %4815 = vst [vmem:[#allocation26_spill] sm:$0xff] %v4054_v36  ;;  %4816 = vst [vmem:[#allocation27_spill] sm:$0xff] %v4057_v51  ;;  %v463_v58 = vld [vmem:[#allocation8 + $0x360] sm:$0xff]  ;;  %v468_v0 = vld [vmem:[#allocation8 + $0x388] sm:$0xff]  ;;  %v4063_v2 = vpack.c.bf16 %v449_v39, %v445_v37  ;;  %v4066_v11 = vpack.c.bf16 %v458_v44, %v454_v40 }
  0xcd   : > { %2137 = vmatpush1.bf16.msra.mxu0 %v4009_v60  ;;  %4817 = vst [vmem:[#allocation28_spill] sm:$0xff] %v4060_v54  ;;  %v472_v4 = vld [vmem:[#allocation8 + $0x3a8] sm:$0xff]  ;;  %v462_v16 = vld [vmem:[#allocation8 + $0x358] sm:$0xff]  ;;  %v4069_v22 = vpack.c.bf16 %v463_v58, %v459_v55  ;;  %v471_v37 = vld [vmem:[#allocation8 + $0x3a0] sm:$0xff] }
  0xce   : > { %2139 = vmatprep.subr.bf16.mxu0 %v4012_v61  ;;  %2201 = vmatpush1.bf16.msra.mxu1 %v4027_v30  ;;  %4818 = vst [vmem:[#allocation29_spill] sm:$0xff] %v4063_v2  ;;  %4819 = vst [vmem:[#allocation30_spill] sm:$0xff] %v4066_v11  ;;  %v466_v20 = vld [vmem:[#allocation8 + $0x378] sm:$0xff]  ;;  %v4072_v29 = vpack.c.bf16 %v472_v4, %v468_v0  ;;  %v476_v39 = vld [vmem:[#allocation8 + $0x3c8] sm:$0xff] }
  0xcf   : > { %2203 = vmatprep.subr.bf16.mxu1 %v4030_v33  ;;  %4820 = vst [vmem:[#allocation31_spill] sm:$0xff] %v4069_v22  ;;  %v480_v40 = vld [vmem:[#allocation8 + $0x3e8] sm:$0xff]  ;;  %v4078_v44 = vpack.c.bf16 %v466_v20, %v462_v16  ;;  %v470_v55 = vld [vmem:[#allocation8 + $0x398] sm:$0xff]  ;;  %v469_v20 = vld [vmem:[#allocation8 + $0x390] sm:$0xff] }
  0xd0   : > { %4821 = vst [vmem:[#allocation32_spill] sm:$0xff] %v4072_v29  ;;  %v474_v58 = vld [vmem:[#allocation8 + $0x3b8] sm:$0xff]  ;;  %v4084_v4 = vpack.c.bf16 %v480_v40, %v476_v39  ;;  %v481_v40 = vld [vmem:[#allocation8 + $0x3f0] sm:$0xff] }
  0xd1   : > { %2141 = vmatpush1.bf16.msra.mxu0 %v4021_v19  ;;  %4823 = vst [vmem:[#allocation34_spill] sm:$0xff] %v4078_v44  ;;  %v4090_v16 = vpack.c.bf16 %v474_v58, %v470_v55  ;;  %v486_v55 = vld [vmem:[%s3898_s11] sm:$0xff] }
  0xd2   : > { %2143 = vmatprep.subr.bf16.mxu0 %v4024_v21  ;;  %2205 = vmatpush1.bf16.msra.mxu1 %v4039_v57  ;;  %4825 = vst [vmem:[#allocation36_spill] sm:$0xff] %v4084_v4 }
  0xd3   : > { %2207 = vmatprep.subr.bf16.mxu1 %v4042_v62  ;;  %v453_v62 = vld [vmem:[#allocation8 + $0x310] sm:$0xff]  ;;  %4827 = vst [vmem:[#allocation38_spill] sm:$0xff] %v4090_v16 }
  0xd5   : > { %2145 = vmatpush1.bf16.msra.mxu0 %v4033_v45 }
  0xd6   : > { %2147 = vmatprep.subr.bf16.mxu0 %v4036_v48  ;;  %2209 = vmatpush1.bf16.msra.mxu1 %v4051_v28  ;;  %v467_v28 = vld [vmem:[#allocation8 + $0x380] sm:$0xff] }
  0xd7   : > { %2211 = vmatprep.subr.bf16.mxu1 %v4054_v36  ;;  %v4081_v0 = vpack.c.bf16 %v471_v37, %v467_v28  ;;  %v482_v28 = vld [vmem:[#allocation8 + $0x3f8] sm:$0xff] }
  0xd9   : > { %2149 = vmatpush1.bf16.msra.mxu0 %v4045_v12  ;;  %v457_v12 = vld [vmem:[#allocation8 + $0x330] sm:$0xff]  ;;  %4824 = vst [vmem:[#allocation35_spill] sm:$0xff] %v4081_v0 }
  0xda   : > { %2151 = vmatprep.subr.bf16.mxu0 %v4048_v13  ;;  %2213 = vmatpush1.bf16.msra.mxu1 %v4063_v2  ;;  %v4075_v36 = vpack.c.bf16 %v457_v12, %v453_v62  ;;  %v461_v13 = vld [vmem:[#allocation8 + $0x350] sm:$0xff]  ;;  %v475_v2 = vld [vmem:[#allocation8 + $0x3c0] sm:$0xff] }
  0xdb   : > { %2215 = vmatprep.subr.bf16.mxu1 %v4066_v11  ;;  %v479_v62 = vld [vmem:[#allocation8 + $0x3e0] sm:$0xff]  ;;  %v473_v11 = vld [vmem:[#allocation8 + $0x3b0] sm:$0xff] }
  0xdc   : > { %4822 = vst [vmem:[#allocation33_spill] sm:$0xff] %v4075_v36  ;;  %v4093_v37 = vpack.c.bf16 %v479_v62, %v475_v2  ;;  %v4097_v39 = vpack.c.bf16 %v473_v11, %v469_v20  ;;  %v4832_v2 = vld [vmem:[#allocation22_spill] sm:$0xff]  ;;  %v4833_v11 = vld [vmem:[#allocation23_spill] sm:$0xff]  ;;  %v4835_v62 = vld [vmem:[#allocation25_spill] sm:$0xff] }
  0xdd   : > { %2153 = vmatpush1.bf16.msra.mxu0 %v4057_v51  ;;  %v465_v51 = vld [vmem:[#allocation8 + $0x370] sm:$0xff]  ;;  %v4836_v20 = vld [vmem:[#allocation26_spill] sm:$0xff] }
  0xde   : > { %2155 = vmatprep.subr.bf16.mxu0 %v4060_v54  ;;  %2217 = vmatpush1.bf16.msra.mxu1 %v4075_v36  ;;  %v4087_v12 = vpack.c.bf16 %v465_v51, %v461_v13  ;;  %4828 = vst [vmem:[#allocation39_spill] sm:$0xff] %v4093_v37  ;;  %4829 = vst [vmem:[#allocation40_spill] sm:$0xff] %v4097_v39  ;;  %v477_v51 = vld [vmem:[#allocation8 + $0x3d0] sm:$0xff] }
  0xdf   : > { %2219 = vmatprep.subr.bf16.mxu1 %v4078_v44  ;;  %v4105_v58 = vpack.c.bf16 %v481_v40, %v477_v51  ;;  %v4838_v51 = vld [vmem:[#allocation29_spill] sm:$0xff]  ;;  %v4839_v40 = vld [vmem:[#allocation30_spill] sm:$0xff] }
  0xe0   : > { %4826 = vst [vmem:[#allocation37_spill] sm:$0xff] %v4087_v12 }
  0xe1   : > { %2157 = vmatpush1.bf16.msra.mxu0 %v4069_v22  ;;  %v478_v22 = vld [vmem:[#allocation8 + $0x3d8] sm:$0xff]  ;;  %4831 = vst [vmem:[#allocation42_spill] sm:$0xff] %v4105_v58 }
  0xe2   : > { %2159 = vmatprep.subr.bf16.mxu0 %v4072_v29  ;;  %2221 = vmatpush1.bf16.msra.mxu1 %v4087_v12  ;;  %v4100_v13 = vpack.c.bf16 %v482_v28, %v478_v22  ;;  %v4834_v22 = vld [vmem:[#allocation24_spill] sm:$0xff]  ;;  %v4837_v28 = vld [vmem:[#allocation27_spill] sm:$0xff] }
  0xe3   : > { %2223 = vmatprep.subr.bf16.mxu1 %v4090_v16 }
  0xe4   : > { %4830 = vst [vmem:[#allocation41_spill] sm:$0xff] %v4100_v13 }
  0xe5   : > { %2161 = vmatpush1.bf16.msra.mxu0 %v4081_v0 }
  0xe6   : > { %2163 = vmatprep.subr.bf16.mxu0 %v4084_v4  ;;  %2225 = vmatpush1.bf16.msra.mxu1 %v4097_v39 }
  0xe7   : > { %2227 = vmatprep.subr.bf16.mxu1 %v4100_v13 }
  0xe9   : > { %2165 = vmatpush1.bf16.msra.mxu0 %v4093_v37 }
  0xea   : > { %2231 = vmatprep.subr.bf16.mxu0 %v3916_v5  ;;  %2229 = vmatpush1.bf16.msra.mxu1 %v4105_v58 }
  0xeb   : > { %2295 = vmatprep.subr.bf16.mxu1 %v3929_v23 }
  0xec   : > { %573 = vmatmul.mubr.f32.vlgmr.msra.gmra.mrb[0].mxu0 %v486_v55 }
  0xed   : > { %2233 = vmatpush1.bf16.msra.mxu0 %v3918_v9  ;;  %644 = vmatmul.mubr.f32.vlgmr.msra.gmra.mrb[0].mxu1 %v486_v55  ;;  %v4840_v55 = vld [vmem:[#allocation31_spill] sm:$0xff] }
  0xee   : > { %2235 = vmatprep.subr.bf16.mxu0 %v3920_v10  ;;  %2297 = vmatpush1.bf16.msra.mxu1 %v3931_v26 }
  0xef   : > { %2299 = vmatprep.subr.bf16.mxu1 %v3941_v34 }
  0xf1   : > { %2237 = vmatpush1.bf16.msra.mxu0 %v3924_v15 }
  0xf2   : > { %2239 = vmatprep.subr.bf16.mxu0 %v3927_v18  ;;  %2301 = vmatpush1.bf16.msra.mxu1 %v3943_v38 }
  0xf3   : > { %2303 = vmatprep.subr.bf16.mxu1 %v3949_v46 }
  0xf5   : > { %2241 = vmatpush1.bf16.msra.mxu0 %v3934_v27 }
  0xf6   : > { %2243 = vmatprep.subr.bf16.mxu0 %v3938_v31  ;;  %2305 = vmatpush1.bf16.msra.mxu1 %v3955_v49 }
  0xf7   : > { %2307 = vmatprep.subr.bf16.mxu1 %v3958_v53 }
  0xf9   : > { %2245 = vmatpush1.bf16.msra.mxu0 %v3947_v43 }
  0xfa   : > { %2247 = vmatprep.subr.bf16.mxu0 %v3952_v47  ;;  %2309 = vmatpush1.bf16.msra.mxu1 %v3967_v63 }
  0xfb   : > { %2311 = vmatprep.subr.bf16.mxu1 %v3970_v1 }
  0xfd   : > { %2249 = vmatpush1.bf16.msra.mxu0 %v3961_v56 }
  0xfe   : > { %2251 = vmatprep.subr.bf16.mxu0 %v3964_v59  ;;  %2313 = vmatpush1.bf16.msra.mxu1 %v3979_v14 }
  0xff   : > { %2315 = vmatprep.subr.bf16.mxu1 %v3982_v17 }
 0x101   : > { %2253 = vmatpush1.bf16.msra.mxu0 %v3973_v7 }
 0x102   : > { %2255 = vmatprep.subr.bf16.mxu0 %v3976_v8  ;;  %2317 = vmatpush1.bf16.msra.mxu1 %v3991_v32 }
 0x103   : > { %2319 = vmatprep.subr.bf16.mxu1 %v3994_v35 }
 0x105   : > { %2257 = vmatpush1.bf16.msra.mxu0 %v3985_v24 }
 0x106   : > { %2259 = vmatprep.subr.bf16.mxu0 %v3988_v25  ;;  %2321 = vmatpush1.bf16.msra.mxu1 %v4003_v50 }
 0x107   : > { %2323 = vmatprep.subr.bf16.mxu1 %v4006_v52 }
 0x109   : > { %2261 = vmatpush1.bf16.msra.mxu0 %v3997_v41 }
 0x10a   : > { %2263 = vmatprep.subr.bf16.mxu0 %v4000_v42  ;;  %2325 = vmatpush1.bf16.msra.mxu1 %v4015_v3 }
 0x10b   : > { %2327 = vmatprep.subr.bf16.mxu1 %v4018_v6 }
 0x10d   : > { %2265 = vmatpush1.bf16.msra.mxu0 %v4009_v60 }
 0x10e   : > { %2267 = vmatprep.subr.bf16.mxu0 %v4012_v61  ;;  %2329 = vmatpush1.bf16.msra.mxu1 %v4027_v30 }
 0x10f   : > { %2331 = vmatprep.subr.bf16.mxu1 %v4030_v33 }
 0x111   : > { %2269 = vmatpush1.bf16.msra.mxu0 %v4021_v19 }
 0x112   : > { %2271 = vmatprep.subr.bf16.mxu0 %v4024_v21  ;;  %2333 = vmatpush1.bf16.msra.mxu1 %v4039_v57 }
 0x113   : > { %2335 = vmatprep.subr.bf16.mxu1 %v4832_v2 }
 0x115   : > { %2273 = vmatpush1.bf16.msra.mxu0 %v4033_v45 }
 0x116   : > { %2275 = vmatprep.subr.bf16.mxu0 %v4036_v48  ;;  %2337 = vmatpush1.bf16.msra.mxu1 %v4835_v62 }
 0x117   : > { %2339 = vmatprep.subr.bf16.mxu1 %v4836_v20 }
 0x119   : > { %2277 = vmatpush1.bf16.msra.mxu0 %v4833_v11 }
 0x11a   : > { %2279 = vmatprep.subr.bf16.mxu0 %v4834_v22  ;;  %2341 = vmatpush1.bf16.msra.mxu1 %v4838_v51 }
 0x11b   : > { %2343 = vmatprep.subr.bf16.mxu1 %v4839_v40 }
 0x11d   : > { %2281 = vmatpush1.bf16.msra.mxu0 %v4837_v28 }
 0x11e   : > { %2283 = vmatprep.subr.bf16.mxu0 %v4060_v54  ;;  %2345 = vmatpush1.bf16.msra.mxu1 %v4075_v36 }
 0x11f   : > { %2347 = vmatprep.subr.bf16.mxu1 %v4078_v44 }
 0x121   : > { %2285 = vmatpush1.bf16.msra.mxu0 %v4840_v55 }
 0x122   : > { %2287 = vmatprep.subr.bf16.mxu0 %v4072_v29  ;;  %2349 = vmatpush1.bf16.msra.mxu1 %v4087_v12  ;;  %v488_v29 = vlaneseq }
 0x123   : > { %2351 = vmatprep.subr.bf16.mxu1 %v4090_v16 }
 0x125   : > { %2289 = vmatpush1.bf16.msra.mxu0 %v4081_v0  ;;  %v489_v0 = vshrl.u32 %v488_v29, 7 }
 0x126   : > { %2291 = vmatprep.subr.bf16.mxu0 %v4084_v4  ;;  %2353 = vmatpush1.bf16.msra.mxu1 %v4097_v39  ;;  %v483_v4 = vld [vmem:[#allocation10] sm:$0xf] }
 0x127   : > { %2355 = vmatprep.subr.bf16.mxu1 %v4100_v13  ;;  %v490_v55 = vsub.s32 0, %v489_v0  ;;  %v494_v44 = vsub.s32 1, %v489_v0  ;;  %v498_v28 = vsub.s32 2, %v489_v0 }
 0x129   : > { %2293 = vmatpush1.bf16.msra.mxu0 %v4093_v37  ;;  %v4175_v12 = vrot.slane %v483_v4, %v490_v55  ;;  %v4177_v16 = vrot.slane %v483_v4, %v494_v44  ;;  %v502_v37 = vsub.s32 3, %v489_v0  ;;  %v4184_v44 = vrot.slane %v483_v4, %v498_v28  ;;  %v485_v0 = vld [vmem:[#allocation14] sm:$0xff] }
 0x12a   : > { %2359 = vmatprep.subr.bf16.mxu0 %v3916_v5  ;;  %2357 = vmatpush1.bf16.msra.mxu1 %v4105_v58 }
 0x12b   : > { %2423 = vmatprep.subr.bf16.mxu1 %v3929_v23  ;;  %4841 = vst [vmem:[#allocation22_spill] sm:$0xff] %v4175_v12  ;;  %v4181_v58 = vrot.slane %v483_v4, %v502_v37 }
 0x1bf   : > { %v574_v54 = vpop.f32.mrb[0].mxu0 }
 0x1c0   : > { %v575_v39 = vadd.f32 %v574_v54, %v4175_v12  ;;  %v576_v5 = vpop.f32.mrb[1].mxu0  ;;  %v645_v29 = vpop.f32.mrb[0].mxu1 }
 0x1c1   : > { %v577_v13 = vadd.f32 %v576_v5, %v4177_v16  ;;  %v647_v40 = vpop.f32.mrb[1].mxu1  ;;  %v646_v51 = vadd.f32 %v645_v29, %v4184_v44  ;;  %v2056_v29 = vld [vmem:[%s3898_s11 + $0x8] sm:$0xff] }
 0x1c2   : > { %v2053_v36 = vmul.f32 -1.442695, %v575_v39  ;;  %v648_v55 = vadd.f32 %v647_v40, %v4181_v58 }
 0x1c3   : > { %v2054_v23 = vmul.f32 -1.442695, %v577_v13 }
 0x1c4   : > { %3233 = vpow2.f32 %v2053_v36  ;;  %v2055_v22 = vmul.f32 -1.442695, %v648_v55 }
 0x1c5   : > { %3235 = vpow2.f32 %v2054_v23 }
 0x1c6   : > { %3237 = vpow2.f32 %v2055_v22 }
 0x1c7   : > { %3239 = vtanh.f32 %v646_v51 }
 0x1ce   : > { %v3234_v54 = vpop.eup %3233 }
 0x1cf   : > { %v3236_v12 = vpop.eup %3235  ;;  %v653_v5 = vadd.f32 1.0, %v3234_v54  ;;  %v4842_v54 = vld [vmem:[#allocation29_spill] sm:$0xff] }
 0x1d0   : > { %v659_v37 = vadd.f32 1.0, %v3236_v12  ;;  %v3238_v36 = vpop.eup %3237 }
 0x1d1   : > { %3241 = vrcp.f32 %v653_v5  ;;  %v3240_v23 = vpop.eup %3239  ;;  %v666_v13 = vadd.f32 1.0, %v3238_v36  ;;  %v4843_v5 = vld [vmem:[#allocation24_spill] sm:$0xff]  ;;  %v4845_v36 = vld [vmem:[#allocation27_spill] sm:$0xff] }
 0x1d2   : > { %3243 = vrcp.f32 %v659_v37  ;;  %v4844_v37 = vld [vmem:[#allocation30_spill] sm:$0xff] }
 0x1d3   : > { %3245 = vrcp.f32 %v666_v13  ;;  %v4849_v13 = vld [vmem:[#allocation31_spill] sm:$0xff] }
 0x1db   : > { %v3242_v39 = vpop.eup %3241 }
 0x1dc   : > { %v3244_v4 = vpop.eup %3243  ;;  %v670_v28 = vmul.f32 %v3242_v39, %v3240_v23  ;;  %v4846_v23 = vld [vmem:[#allocation33_spill] sm:$0xff]  ;;  %v4848_v39 = vld [vmem:[#allocation34_spill] sm:$0xff] }
 0x1dd   : > { %v669_v40 = vmul.f32 %v3244_v4, %v485_v0  ;;  %v3246_v22 = vpop.eup %3245  ;;  %v4847_v0 = vld [vmem:[#allocation28_spill] sm:$0xff]  ;;  %v4850_v4 = vld [vmem:[#allocation37_spill] sm:$0xff] }
 0x1df   : > { %v4187_v55 = vadd.f32 %v670_v28, %v669_v40  ;;  %v4851_v28 = vld [vmem:[#allocation32_spill] sm:$0xff]  ;;  %v4852_v40 = vld [vmem:[#allocation38_spill] sm:$0xff] }
 0x1e1   : > { %3247 = vtanh.f32 %v4187_v55 }
 0x1eb   : > { %v3248_v51 = vpop.eup %3247 }
 0x1ec   : > { %v673_v12 = vmul.f32 %v3248_v51, %v3246_v22  ;;  %v4853_v22 = vld [vmem:[#allocation35_spill] sm:$0xff]  ;;  %v4854_v51 = vld [vmem:[#allocation40_spill] sm:$0xff] }
 0x1ee   : > { %674 = vst [vmem:[%s3912_s9] sm:$0xff] %v673_v12  ;;  %741 = vmatprep.mubr.f32.mxu0 %v673_v12  ;;  %812 = vmatprep.mubr.f32.mxu1 %v673_v12  ;;  %v4855_v12 = vld [vmem:[#allocation36_spill] sm:$0xff] }
 0x1ef   : > { %742 = vmatmul.mubr.f32.vlgmr.msra.gmra.mrb[2].mxu0 %v2056_v29  ;;  %813 = vmatmul.mubr.f32.vlgmr.msra.gmra.mrb[2].mxu1 %v2056_v29  ;;  %v4856_v29 = vld [vmem:[#allocation41_spill] sm:$0xff] }
 0x1f0   : > { %2361 = vmatpush1.bf16.msra.mxu0 %v3918_v9  ;;  %2425 = vmatpush1.bf16.msra.mxu1 %v3931_v26 }
 0x1f1   : > { %2363 = vmatprep.subr.bf16.mxu0 %v3920_v10  ;;  %2427 = vmatprep.subr.bf16.mxu1 %v3941_v34 }
 0x1f4   : > { %2365 = vmatpush1.bf16.msra.mxu0 %v3924_v15  ;;  %2429 = vmatpush1.bf16.msra.mxu1 %v3943_v38 }
 0x1f5   : > { %2367 = vmatprep.subr.bf16.mxu0 %v3927_v18  ;;  %2431 = vmatprep.subr.bf16.mxu1 %v3949_v46 }
 0x1f8   : > { %2369 = vmatpush1.bf16.msra.mxu0 %v3934_v27  ;;  %2433 = vmatpush1.bf16.msra.mxu1 %v3955_v49 }
 0x1f9   : > { %2371 = vmatprep.subr.bf16.mxu0 %v3938_v31  ;;  %2435 = vmatprep.subr.bf16.mxu1 %v3958_v53 }
 0x1fc   : > { %2373 = vmatpush1.bf16.msra.mxu0 %v3947_v43  ;;  %2437 = vmatpush1.bf16.msra.mxu1 %v3967_v63 }
 0x1fd   : > { %2375 = vmatprep.subr.bf16.mxu0 %v3952_v47  ;;  %2439 = vmatprep.subr.bf16.mxu1 %v3970_v1 }
 0x200   : > { %2377 = vmatpush1.bf16.msra.mxu0 %v3961_v56  ;;  %2441 = vmatpush1.bf16.msra.mxu1 %v3979_v14 }
 0x201   : > { %2379 = vmatprep.subr.bf16.mxu0 %v3964_v59  ;;  %2443 = vmatprep.subr.bf16.mxu1 %v3982_v17 }
 0x204   : > { %2381 = vmatpush1.bf16.msra.mxu0 %v3973_v7  ;;  %2445 = vmatpush1.bf16.msra.mxu1 %v3991_v32 }
 0x205   : > { %2383 = vmatprep.subr.bf16.mxu0 %v3976_v8  ;;  %2447 = vmatprep.subr.bf16.mxu1 %v3994_v35 }
 0x208   : > { %2385 = vmatpush1.bf16.msra.mxu0 %v3985_v24  ;;  %2449 = vmatpush1.bf16.msra.mxu1 %v4003_v50 }
 0x209   : > { %2387 = vmatprep.subr.bf16.mxu0 %v3988_v25  ;;  %2451 = vmatprep.subr.bf16.mxu1 %v4006_v52 }
 0x20c   : > { %2389 = vmatpush1.bf16.msra.mxu0 %v3997_v41  ;;  %2453 = vmatpush1.bf16.msra.mxu1 %v4015_v3 }
 0x20d   : > { %2391 = vmatprep.subr.bf16.mxu0 %v4000_v42  ;;  %2455 = vmatprep.subr.bf16.mxu1 %v4018_v6 }
 0x210   : > { %2393 = vmatpush1.bf16.msra.mxu0 %v4009_v60  ;;  %2457 = vmatpush1.bf16.msra.mxu1 %v4027_v30 }
 0x211   : > { %2395 = vmatprep.subr.bf16.mxu0 %v4012_v61  ;;  %2459 = vmatprep.subr.bf16.mxu1 %v4030_v33 }
 0x214   : > { %2397 = vmatpush1.bf16.msra.mxu0 %v4021_v19  ;;  %2461 = vmatpush1.bf16.msra.mxu1 %v4039_v57 }
 0x215   : > { %2399 = vmatprep.subr.bf16.mxu0 %v4024_v21  ;;  %2463 = vmatprep.subr.bf16.mxu1 %v4832_v2 }
 0x218   : > { %2401 = vmatpush1.bf16.msra.mxu0 %v4033_v45  ;;  %2465 = vmatpush1.bf16.msra.mxu1 %v4835_v62 }
 0x219   : > { %2403 = vmatprep.subr.bf16.mxu0 %v4036_v48  ;;  %2467 = vmatprep.subr.bf16.mxu1 %v4836_v20 }
 0x21c   : > { %2405 = vmatpush1.bf16.msra.mxu0 %v4833_v11  ;;  %2469 = vmatpush1.bf16.msra.mxu1 %v4842_v54 }
 0x21d   : > { %2407 = vmatprep.subr.bf16.mxu0 %v4843_v5  ;;  %2471 = vmatprep.subr.bf16.mxu1 %v4844_v37 }
 0x220   : > { %2409 = vmatpush1.bf16.msra.mxu0 %v4845_v36  ;;  %2473 = vmatpush1.bf16.msra.mxu1 %v4846_v23  ;;  %v4857_v23 = vld [vmem:[#allocation39_spill] sm:$0xff]  ;;  %v4861_v36 = vld [vmem:[#allocation22_spill] sm:$0xff] }
 0x221   : > { %2411 = vmatprep.subr.bf16.mxu0 %v4847_v0  ;;  %2475 = vmatprep.subr.bf16.mxu1 %v4848_v39  ;;  %v4858_v0 = vld [vmem:[#allocation42_spill] sm:$0xff]  ;;  %v4859_v39 = vld [vmem:[#allocation20_spill] sm:$0xff] }
 0x224   : > { %2413 = vmatpush1.bf16.msra.mxu0 %v4849_v13  ;;  %2477 = vmatpush1.bf16.msra.mxu1 %v4850_v4  ;;  %v4860_v13 = vld [vmem:[#allocation21_spill] sm:$0xff] }
 0x225   : > { %2415 = vmatprep.subr.bf16.mxu0 %v4851_v28  ;;  %2479 = vmatprep.subr.bf16.mxu1 %v4852_v40 }
 0x228   : > { %2417 = vmatpush1.bf16.msra.mxu0 %v4853_v22  ;;  %2481 = vmatpush1.bf16.msra.mxu1 %v4854_v51 }
 0x229   : > { %2419 = vmatprep.subr.bf16.mxu0 %v4855_v12  ;;  %2483 = vmatprep.subr.bf16.mxu1 %v4856_v29 }
 0x22c   : > { %2421 = vmatpush1.bf16.msra.mxu0 %v4857_v23  ;;  %2485 = vmatpush1.bf16.msra.mxu1 %v4858_v0 }
 0x22d   : > { %2487 = vmatprep.subr.bf16.mxu0 %v4859_v39  ;;  %2551 = vmatprep.subr.bf16.mxu1 %v4860_v13 }
 0x2c2   : > { %v743_v4 = vpop.f32.mrb[2].mxu0  ;;  %v814_v28 = vpop.f32.mrb[2].mxu1 }
 0x2c3   : > { %v744_v40 = vadd.f32 %v743_v4, %v4861_v36  ;;  %v745_v37 = vpop.f32.mrb[3].mxu0  ;;  %v816_v22 = vpop.f32.mrb[3].mxu1  ;;  %v815_v0 = vadd.f32 %v814_v28, %v4184_v44  ;;  %v2061_v28 = vld [vmem:[%s3898_s11 + $0x10] sm:$0xff] }
 0x2c4   : > { %v746_v51 = vadd.f32 %v745_v37, %v4177_v16  ;;  %v817_v23 = vadd.f32 %v816_v22, %v4181_v58 }
 0x2c5   : > { %v2057_v5 = vmul.f32 -1.442695, %v744_v40 }
 0x2c6   : > { %v2058_v12 = vmul.f32 -1.442695, %v746_v51  ;;  %v2059_v29 = vmul.f32 -1.442695, %v817_v23 }
 0x2c7   : > { %3249 = vpow2.f32 %v2057_v5 }
 0x2c8   : > { %3251 = vpow2.f32 %v2058_v12 }
 0x2c9   : > { %3253 = vpow2.f32 %v2059_v29  ;;  %v4865_v29 = vld [vmem:[#allocation30_spill] sm:$0xff] }
 0x2ca   : > { %3255 = vtanh.f32 %v815_v0 }
 0x2d1   : > { %v3250_v39 = vpop.eup %3249 }
 0x2d2   : > { %v3252_v13 = vpop.eup %3251  ;;  %v822_v54 = vadd.f32 1.0, %v3250_v39 }
 0x2d3   : > { %v828_v11 = vadd.f32 1.0, %v3252_v13  ;;  %v3254_v37 = vpop.eup %3253 }
 0x2d4   : > { %3257 = vrcp.f32 %v822_v54  ;;  %v3256_v4 = vpop.eup %3255  ;;  %v835_v5 = vadd.f32 1.0, %v3254_v37  ;;  %v4864_v54 = vld [vmem:[#allocation24_spill] sm:$0xff]  ;;  %v4866_v37 = vld [vmem:[#allocation27_spill] sm:$0xff] }
 0x2d5   : > { %3259 = vrcp.f32 %v828_v11  ;;  %v4862_v11 = vld [vmem:[#allocation23_spill] sm:$0xff] }
 0x2d6   : > { %3261 = vrcp.f32 %v835_v5  ;;  %v4869_v5 = vld [vmem:[#allocation34_spill] sm:$0xff] }
 0x2de   : > { %v3258_v40 = vpop.eup %3257 }
 0x2df   : > { %v3260_v51 = vpop.eup %3259  ;;  %v839_v12 = vmul.f32 %v3258_v40, %v3256_v4  ;;  %v4867_v4 = vld [vmem:[#allocation33_spill] sm:$0xff]  ;;  %v4868_v40 = vld [vmem:[#allocation28_spill] sm:$0xff] }
 0x2e0   : > { %v838_v23 = vmul.f32 %v3260_v51, %v4187_v55  ;;  %v3262_v39 = vpop.eup %3261  ;;  %v4863_v55 = vld [vmem:[#allocation29_spill] sm:$0xff]  ;;  %v4870_v51 = vld [vmem:[#allocation31_spill] sm:$0xff] }
 0x2e2   : > { %v4261_v22 = vadd.f32 %v839_v12, %v838_v23  ;;  %v4871_v12 = vld [vmem:[#allocation37_spill] sm:$0xff]  ;;  %v4872_v23 = vld [vmem:[#allocation32_spill] sm:$0xff] }
 0x2e4   : > { %3263 = vtanh.f32 %v4261_v22 }
 0x2ee   : > { %v3264_v0 = vpop.eup %3263 }
 0x2ef   : > { %v842_v13 = vmul.f32 %v3264_v0, %v3262_v39  ;;  %v4873_v39 = vld [vmem:[#allocation38_spill] sm:$0xff]  ;;  %v4874_v0 = vld [vmem:[#allocation35_spill] sm:$0xff] }
 0x2f1   : > { %2060 = vst [vmem:[%s3912_s9 + $0x8] sm:$0xff] %v842_v13  ;;  %911 = vmatprep.mubr.f32.mxu0 %v842_v13  ;;  %982 = vmatprep.mubr.f32.mxu1 %v842_v13  ;;  %v4875_v13 = vld [vmem:[#allocation40_spill] sm:$0xff] }
 0x2f2   : > { %912 = vmatmul.mubr.f32.vlgmr.msra.gmra.mrb[4].mxu0 %v2061_v28  ;;  %983 = vmatmul.mubr.f32.vlgmr.msra.gmra.mrb[4].mxu1 %v2061_v28  ;;  %v4876_v28 = vld [vmem:[#allocation36_spill] sm:$0xff] }
 0x2f3   : > { %2489 = vmatpush1.bf16.msra.mxu0 %v3918_v9  ;;  %2553 = vmatpush1.bf16.msra.mxu1 %v3931_v26 }
 0x2f4   : > { %2491 = vmatprep.subr.bf16.mxu0 %v3920_v10  ;;  %2555 = vmatprep.subr.bf16.mxu1 %v3941_v34 }
 0x2f7   : > { %2493 = vmatpush1.bf16.msra.mxu0 %v3924_v15  ;;  %2557 = vmatpush1.bf16.msra.mxu1 %v3943_v38 }
 0x2f8   : > { %2495 = vmatprep.subr.bf16.mxu0 %v3927_v18  ;;  %2559 = vmatprep.subr.bf16.mxu1 %v3949_v46 }
 0x2fb   : > { %2497 = vmatpush1.bf16.msra.mxu0 %v3934_v27  ;;  %2561 = vmatpush1.bf16.msra.mxu1 %v3955_v49 }
 0x2fc   : > { %2499 = vmatprep.subr.bf16.mxu0 %v3938_v31  ;;  %2563 = vmatprep.subr.bf16.mxu1 %v3958_v53 }
 0x2ff   : > { %2501 = vmatpush1.bf16.msra.mxu0 %v3947_v43  ;;  %2565 = vmatpush1.bf16.msra.mxu1 %v3967_v63 }
 0x300   : > { %2503 = vmatprep.subr.bf16.mxu0 %v3952_v47  ;;  %2567 = vmatprep.subr.bf16.mxu1 %v3970_v1 }
 0x303   : > { %2505 = vmatpush1.bf16.msra.mxu0 %v3961_v56  ;;  %2569 = vmatpush1.bf16.msra.mxu1 %v3979_v14 }
 0x304   : > { %2507 = vmatprep.subr.bf16.mxu0 %v3964_v59  ;;  %2571 = vmatprep.subr.bf16.mxu1 %v3982_v17 }
 0x307   : > { %2509 = vmatpush1.bf16.msra.mxu0 %v3973_v7  ;;  %2573 = vmatpush1.bf16.msra.mxu1 %v3991_v32 }
 0x308   : > { %2511 = vmatprep.subr.bf16.mxu0 %v3976_v8  ;;  %2575 = vmatprep.subr.bf16.mxu1 %v3994_v35 }
 0x30b   : > { %2513 = vmatpush1.bf16.msra.mxu0 %v3985_v24  ;;  %2577 = vmatpush1.bf16.msra.mxu1 %v4003_v50 }
 0x30c   : > { %2515 = vmatprep.subr.bf16.mxu0 %v3988_v25  ;;  %2579 = vmatprep.subr.bf16.mxu1 %v4006_v52 }
 0x30f   : > { %2517 = vmatpush1.bf16.msra.mxu0 %v3997_v41  ;;  %2581 = vmatpush1.bf16.msra.mxu1 %v4015_v3 }
 0x310   : > { %2519 = vmatprep.subr.bf16.mxu0 %v4000_v42  ;;  %2583 = vmatprep.subr.bf16.mxu1 %v4018_v6 }
 0x313   : > { %2521 = vmatpush1.bf16.msra.mxu0 %v4009_v60  ;;  %2585 = vmatpush1.bf16.msra.mxu1 %v4027_v30 }
 0x314   : > { %2523 = vmatprep.subr.bf16.mxu0 %v4012_v61  ;;  %2587 = vmatprep.subr.bf16.mxu1 %v4030_v33 }
 0x317   : > { %2525 = vmatpush1.bf16.msra.mxu0 %v4021_v19  ;;  %2589 = vmatpush1.bf16.msra.mxu1 %v4039_v57 }
 0x318   : > { %2527 = vmatprep.subr.bf16.mxu0 %v4024_v21  ;;  %2591 = vmatprep.subr.bf16.mxu1 %v4832_v2 }
 0x31b   : > { %2529 = vmatpush1.bf16.msra.mxu0 %v4033_v45  ;;  %2593 = vmatpush1.bf16.msra.mxu1 %v4835_v62 }
 0x31c   : > { %2531 = vmatprep.subr.bf16.mxu0 %v4036_v48  ;;  %2595 = vmatprep.subr.bf16.mxu1 %v4836_v20 }
 0x31f   : > { %2533 = vmatpush1.bf16.msra.mxu0 %v4862_v11  ;;  %2597 = vmatpush1.bf16.msra.mxu1 %v4863_v55 }
 0x320   : > { %2535 = vmatprep.subr.bf16.mxu0 %v4864_v54  ;;  %2599 = vmatprep.subr.bf16.mxu1 %v4865_v29 }
 0x323   : > { %2537 = vmatpush1.bf16.msra.mxu0 %v4866_v37  ;;  %2601 = vmatpush1.bf16.msra.mxu1 %v4867_v4  ;;  %v4877_v37 = vld [vmem:[#allocation41_spill] sm:$0xff]  ;;  %v4878_v4 = vld [vmem:[#allocation39_spill] sm:$0xff] }
 0x324   : > { %2539 = vmatprep.subr.bf16.mxu0 %v4868_v40  ;;  %2603 = vmatprep.subr.bf16.mxu1 %v4869_v5  ;;  %v4879_v40 = vld [vmem:[#allocation42_spill] sm:$0xff]  ;;  %v4880_v5 = vld [vmem:[#allocation20_spill] sm:$0xff] }
 0x327   : > { %2541 = vmatpush1.bf16.msra.mxu0 %v4870_v51  ;;  %2605 = vmatpush1.bf16.msra.mxu1 %v4871_v12  ;;  %v4881_v51 = vld [vmem:[#allocation21_spill] sm:$0xff] }
 0x328   : > { %2543 = vmatprep.subr.bf16.mxu0 %v4872_v23  ;;  %2607 = vmatprep.subr.bf16.mxu1 %v4873_v39 }
 0x32b   : > { %2545 = vmatpush1.bf16.msra.mxu0 %v4874_v0  ;;  %2609 = vmatpush1.bf16.msra.mxu1 %v4875_v13 }
 0x32c   : > { %2547 = vmatprep.subr.bf16.mxu0 %v4876_v28  ;;  %2611 = vmatprep.subr.bf16.mxu1 %v4877_v37 }
 0x32f   : > { %2549 = vmatpush1.bf16.msra.mxu0 %v4878_v4  ;;  %2613 = vmatpush1.bf16.msra.mxu1 %v4879_v40 }
 0x330   : > { %2615 = vmatprep.subr.bf16.mxu0 %v4880_v5  ;;  %2679 = vmatprep.subr.bf16.mxu1 %v4881_v51 }
 0x3c5   : > { %v913_v12 = vpop.f32.mrb[4].mxu0  ;;  %v984_v23 = vpop.f32.mrb[4].mxu1 }
 0x3c6   : > { %v914_v39 = vadd.f32 %v913_v12, %v4861_v36  ;;  %v915_v29 = vpop.f32.mrb[5].mxu0  ;;  %v986_v0 = vpop.f32.mrb[5].mxu1  ;;  %v985_v40 = vadd.f32 %v984_v23, %v4184_v44  ;;  %v4885_v23 = vld [vmem:[#allocation30_spill] sm:$0xff] }
 0x3c7   : > { %v916_v13 = vadd.f32 %v915_v29, %v4177_v16  ;;  %v987_v4 = vadd.f32 %v986_v0, %v4181_v58 }
 0x3c8   : > { %v2062_v54 = vmul.f32 -1.442695, %v914_v39 }
 0x3c9   : > { %v2063_v28 = vmul.f32 -1.442695, %v916_v13  ;;  %v2064_v37 = vmul.f32 -1.442695, %v987_v4 }
 0x3ca   : > { %3265 = vpow2.f32 %v2062_v54 }
 0x3cb   : > { %3267 = vpow2.f32 %v2063_v28 }
 0x3cc   : > { %3269 = vpow2.f32 %v2064_v37 }
 0x3cd   : > { %3271 = vtanh.f32 %v985_v40 }
 0x3d4   : > { %v3266_v5 = vpop.eup %3265 }
 0x3d5   : > { %v3268_v51 = vpop.eup %3267  ;;  %v992_v55 = vadd.f32 1.0, %v3266_v5 }
 0x3d6   : > { %v998_v11 = vadd.f32 1.0, %v3268_v51  ;;  %v3270_v29 = vpop.eup %3269  ;;  %v2066_v51 = vld [vmem:[%s3898_s11 + $0x18] sm:$0xff] }
 0x3d7   : > { %3273 = vrcp.f32 %v992_v55  ;;  %v3272_v12 = vpop.eup %3271  ;;  %v1005_v54 = vadd.f32 1.0, %v3270_v29  ;;  %v4884_v55 = vld [vmem:[#allocation24_spill] sm:$0xff]  ;;  %v4886_v29 = vld [vmem:[#allocation27_spill] sm:$0xff] }
 0x3d8   : > { %3275 = vrcp.f32 %v998_v11  ;;  %v4883_v11 = vld [vmem:[#allocation29_spill] sm:$0xff] }
 0x3d9   : > { %3277 = vrcp.f32 %v1005_v54  ;;  %v4889_v54 = vld [vmem:[#allocation34_spill] sm:$0xff] }
 0x3e1   : > { %v3274_v39 = vpop.eup %3273 }
 0x3e2   : > { %v3276_v13 = vpop.eup %3275  ;;  %v1009_v28 = vmul.f32 %v3274_v39, %v3272_v12  ;;  %v4887_v12 = vld [vmem:[#allocation33_spill] sm:$0xff]  ;;  %v4888_v39 = vld [vmem:[#allocation28_spill] sm:$0xff] }
 0x3e3   : > { %v1008_v4 = vmul.f32 %v3276_v13, %v4261_v22  ;;  %v3278_v37 = vpop.eup %3277  ;;  %v4882_v22 = vld [vmem:[#allocation23_spill] sm:$0xff] }
 0x3e4   : > { %v4890_v13 = vld [vmem:[#allocation31_spill] sm:$0xff] }
 0x3e5   : > { %v4335_v0 = vadd.f32 %v1009_v28, %v1008_v4  ;;  %v4891_v28 = vld [vmem:[#allocation37_spill] sm:$0xff]  ;;  %v4892_v4 = vld [vmem:[#allocation32_spill] sm:$0xff] }
 0x3e7   : > { %3279 = vtanh.f32 %v4335_v0 }
 0x3f1   : > { %v3280_v40 = vpop.eup %3279 }
 0x3f2   : > { %v1012_v5 = vmul.f32 %v3280_v40, %v3278_v37  ;;  %v4893_v37 = vld [vmem:[#allocation38_spill] sm:$0xff]  ;;  %v4894_v40 = vld [vmem:[#allocation35_spill] sm:$0xff] }
 0x3f4   : > { %2065 = vst [vmem:[%s3912_s9 + $0x10] sm:$0xff] %v1012_v5  ;;  %1081 = vmatprep.mubr.f32.mxu0 %v1012_v5  ;;  %1152 = vmatprep.mubr.f32.mxu1 %v1012_v5  ;;  %v4895_v5 = vld [vmem:[#allocation40_spill] sm:$0xff] }
 0x3f5   : > { %1082 = vmatmul.mubr.f32.vlgmr.msra.gmra.mrb[6].mxu0 %v2066_v51  ;;  %1153 = vmatmul.mubr.f32.vlgmr.msra.gmra.mrb[6].mxu1 %v2066_v51  ;;  %v4896_v51 = vld [vmem:[#allocation36_spill] sm:$0xff] }
 0x3f6   : > { %2617 = vmatpush1.bf16.msra.mxu0 %v3918_v9  ;;  %2681 = vmatpush1.bf16.msra.mxu1 %v3931_v26 }
 0x3f7   : > { %2619 = vmatprep.subr.bf16.mxu0 %v3920_v10  ;;  %2683 = vmatprep.subr.bf16.mxu1 %v3941_v34 }
 0x3fa   : > { %2621 = vmatpush1.bf16.msra.mxu0 %v3924_v15  ;;  %2685 = vmatpush1.bf16.msra.mxu1 %v3943_v38 }
 0x3fb   : > { %2623 = vmatprep.subr.bf16.mxu0 %v3927_v18  ;;  %2687 = vmatprep.subr.bf16.mxu1 %v3949_v46 }
 0x3fe   : > { %2625 = vmatpush1.bf16.msra.mxu0 %v3934_v27  ;;  %2689 = vmatpush1.bf16.msra.mxu1 %v3955_v49 }
 0x3ff   : > { %2627 = vmatprep.subr.bf16.mxu0 %v3938_v31  ;;  %2691 = vmatprep.subr.bf16.mxu1 %v3958_v53 }
 0x402   : > { %2629 = vmatpush1.bf16.msra.mxu0 %v3947_v43  ;;  %2693 = vmatpush1.bf16.msra.mxu1 %v3967_v63 }
 0x403   : > { %2631 = vmatprep.subr.bf16.mxu0 %v3952_v47  ;;  %2695 = vmatprep.subr.bf16.mxu1 %v3970_v1 }
 0x406   : > { %2633 = vmatpush1.bf16.msra.mxu0 %v3961_v56  ;;  %2697 = vmatpush1.bf16.msra.mxu1 %v3979_v14 }
 0x407   : > { %2635 = vmatprep.subr.bf16.mxu0 %v3964_v59  ;;  %2699 = vmatprep.subr.bf16.mxu1 %v3982_v17 }
 0x40a   : > { %2637 = vmatpush1.bf16.msra.mxu0 %v3973_v7  ;;  %2701 = vmatpush1.bf16.msra.mxu1 %v3991_v32 }
 0x40b   : > { %2639 = vmatprep.subr.bf16.mxu0 %v3976_v8  ;;  %2703 = vmatprep.subr.bf16.mxu1 %v3994_v35 }
 0x40e   : > { %2641 = vmatpush1.bf16.msra.mxu0 %v3985_v24  ;;  %2705 = vmatpush1.bf16.msra.mxu1 %v4003_v50 }
 0x40f   : > { %2643 = vmatprep.subr.bf16.mxu0 %v3988_v25  ;;  %2707 = vmatprep.subr.bf16.mxu1 %v4006_v52 }
 0x412   : > { %2645 = vmatpush1.bf16.msra.mxu0 %v3997_v41  ;;  %2709 = vmatpush1.bf16.msra.mxu1 %v4015_v3 }
 0x413   : > { %2647 = vmatprep.subr.bf16.mxu0 %v4000_v42  ;;  %2711 = vmatprep.subr.bf16.mxu1 %v4018_v6 }
 0x416   : > { %2649 = vmatpush1.bf16.msra.mxu0 %v4009_v60  ;;  %2713 = vmatpush1.bf16.msra.mxu1 %v4027_v30 }
 0x417   : > { %2651 = vmatprep.subr.bf16.mxu0 %v4012_v61  ;;  %2715 = vmatprep.subr.bf16.mxu1 %v4030_v33 }
 0x41a   : > { %2653 = vmatpush1.bf16.msra.mxu0 %v4021_v19  ;;  %2717 = vmatpush1.bf16.msra.mxu1 %v4039_v57 }
 0x41b   : > { %2655 = vmatprep.subr.bf16.mxu0 %v4024_v21  ;;  %2719 = vmatprep.subr.bf16.mxu1 %v4832_v2 }
 0x41e   : > { %2657 = vmatpush1.bf16.msra.mxu0 %v4033_v45  ;;  %2721 = vmatpush1.bf16.msra.mxu1 %v4835_v62 }
 0x41f   : > { %2659 = vmatprep.subr.bf16.mxu0 %v4036_v48  ;;  %2723 = vmatprep.subr.bf16.mxu1 %v4836_v20 }
 0x422   : > { %2661 = vmatpush1.bf16.msra.mxu0 %v4882_v22  ;;  %2725 = vmatpush1.bf16.msra.mxu1 %v4883_v11 }
 0x423   : > { %2663 = vmatprep.subr.bf16.mxu0 %v4884_v55  ;;  %2727 = vmatprep.subr.bf16.mxu1 %v4885_v23 }
 0x426   : > { %2665 = vmatpush1.bf16.msra.mxu0 %v4886_v29  ;;  %2729 = vmatpush1.bf16.msra.mxu1 %v4887_v12  ;;  %v4897_v29 = vld [vmem:[#allocation41_spill] sm:$0xff]  ;;  %v4898_v12 = vld [vmem:[#allocation39_spill] sm:$0xff] }
 0x427   : > { %2667 = vmatprep.subr.bf16.mxu0 %v4888_v39  ;;  %2731 = vmatprep.subr.bf16.mxu1 %v4889_v54  ;;  %v4899_v39 = vld [vmem:[#allocation42_spill] sm:$0xff]  ;;  %v4900_v54 = vld [vmem:[#allocation20_spill] sm:$0xff] }
 0x42a   : > { %2669 = vmatpush1.bf16.msra.mxu0 %v4890_v13  ;;  %2733 = vmatpush1.bf16.msra.mxu1 %v4891_v28  ;;  %v4901_v13 = vld [vmem:[#allocation21_spill] sm:$0xff] }
 0x42b   : > { %2671 = vmatprep.subr.bf16.mxu0 %v4892_v4  ;;  %2735 = vmatprep.subr.bf16.mxu1 %v4893_v37 }
 0x42e   : > { %2673 = vmatpush1.bf16.msra.mxu0 %v4894_v40  ;;  %2737 = vmatpush1.bf16.msra.mxu1 %v4895_v5 }
 0x42f   : > { %2675 = vmatprep.subr.bf16.mxu0 %v4896_v51  ;;  %2739 = vmatprep.subr.bf16.mxu1 %v4897_v29 }
 0x432   : > { %2677 = vmatpush1.bf16.msra.mxu0 %v4898_v12  ;;  %2741 = vmatpush1.bf16.msra.mxu1 %v4899_v39 }
 0x433   : > { %2743 = vmatprep.subr.bf16.mxu0 %v4900_v54  ;;  %2807 = vmatprep.subr.bf16.mxu1 %v4901_v13 }
 0x4c8   : > { %v1083_v28 = vpop.f32.mrb[6].mxu0  ;;  %v1154_v4 = vpop.f32.mrb[6].mxu1 }
 0x4c9   : > { %v1084_v37 = vadd.f32 %v1083_v28, %v4861_v36  ;;  %v1085_v23 = vpop.f32.mrb[7].mxu0  ;;  %v1156_v40 = vpop.f32.mrb[7].mxu1  ;;  %v1155_v39 = vadd.f32 %v1154_v4, %v4184_v44  ;;  %v4905_v4 = vld [vmem:[#allocation30_spill] sm:$0xff] }
 0x4ca   : > { %v1086_v5 = vadd.f32 %v1085_v23, %v4177_v16  ;;  %v1157_v12 = vadd.f32 %v1156_v40, %v4181_v58 }
 0x4cb   : > { %v2067_v55 = vmul.f32 -1.442695, %v1084_v37 }
 0x4cc   : > { %v2068_v51 = vmul.f32 -1.442695, %v1086_v5  ;;  %v2069_v29 = vmul.f32 -1.442695, %v1157_v12 }
 0x4cd   : > { %3281 = vpow2.f32 %v2067_v55 }
 0x4ce   : > { %3283 = vpow2.f32 %v2068_v51 }
 0x4cf   : > { %3285 = vpow2.f32 %v2069_v29 }
 0x4d0   : > { %3287 = vtanh.f32 %v1155_v39 }
 0x4d7   : > { %v3282_v54 = vpop.eup %3281 }
 0x4d8   : > { %v3284_v13 = vpop.eup %3283  ;;  %v1162_v11 = vadd.f32 1.0, %v3282_v54 }
 0x4d9   : > { %v1168_v22 = vadd.f32 1.0, %v3284_v13  ;;  %v3286_v23 = vpop.eup %3285  ;;  %v2071_v13 = vld [vmem:[%s3898_s11 + $0x20] sm:$0xff] }
 0x4da   : > { %3289 = vrcp.f32 %v1162_v11  ;;  %v3288_v28 = vpop.eup %3287  ;;  %v1175_v55 = vadd.f32 1.0, %v3286_v23  ;;  %v4904_v11 = vld [vmem:[#allocation24_spill] sm:$0xff]  ;;  %v4906_v23 = vld [vmem:[#allocation27_spill] sm:$0xff] }
 0x4db   : > { %3291 = vrcp.f32 %v1168_v22  ;;  %v4903_v22 = vld [vmem:[#allocation29_spill] sm:$0xff] }
 0x4dc   : > { %3293 = vrcp.f32 %v1175_v55  ;;  %v4909_v55 = vld [vmem:[#allocation34_spill] sm:$0xff] }
 0x4e4   : > { %v3290_v37 = vpop.eup %3289 }
 0x4e5   : > { %v3292_v5 = vpop.eup %3291  ;;  %v1179_v51 = vmul.f32 %v3290_v37, %v3288_v28  ;;  %v4907_v28 = vld [vmem:[#allocation33_spill] sm:$0xff]  ;;  %v4908_v37 = vld [vmem:[#allocation28_spill] sm:$0xff] }
 0x4e6   : > { %v1178_v12 = vmul.f32 %v3292_v5, %v4335_v0  ;;  %v3294_v29 = vpop.eup %3293  ;;  %v4902_v0 = vld [vmem:[#allocation23_spill] sm:$0xff] }
 0x4e7   : > { %v4910_v5 = vld [vmem:[#allocation31_spill] sm:$0xff] }
 0x4e8   : > { %v4409_v40 = vadd.f32 %v1179_v51, %v1178_v12  ;;  %v4911_v51 = vld [vmem:[#allocation37_spill] sm:$0xff]  ;;  %v4912_v12 = vld [vmem:[#allocation32_spill] sm:$0xff] }
 0x4ea   : > { %3295 = vtanh.f32 %v4409_v40 }
 0x4f4   : > { %v3296_v39 = vpop.eup %3295 }
 0x4f5   : > { %v1182_v54 = vmul.f32 %v3296_v39, %v3294_v29  ;;  %v4913_v29 = vld [vmem:[#allocation38_spill] sm:$0xff]  ;;  %v4914_v39 = vld [vmem:[#allocation35_spill] sm:$0xff] }
 0x4f7   : > { %2070 = vst [vmem:[%s3912_s9 + $0x18] sm:$0xff] %v1182_v54  ;;  %1251 = vmatprep.mubr.f32.mxu0 %v1182_v54  ;;  %1322 = vmatprep.mubr.f32.mxu1 %v1182_v54  ;;  %v4915_v54 = vld [vmem:[#allocation40_spill] sm:$0xff] }
 0x4f8   : > { %1252 = vmatmul.mubr.f32.vlgmr.msra.gmra.mrb[8].mxu0 %v2071_v13  ;;  %1323 = vmatmul.mubr.f32.vlgmr.msra.gmra.mrb[8].mxu1 %v2071_v13  ;;  %v4916_v13 = vld [vmem:[#allocation36_spill] sm:$0xff] }
 0x4f9   : > { %2745 = vmatpush1.bf16.msra.mxu0 %v3918_v9  ;;  %2809 = vmatpush1.bf16.msra.mxu1 %v3931_v26 }
 0x4fa   : > { %2747 = vmatprep.subr.bf16.mxu0 %v3920_v10  ;;  %2811 = vmatprep.subr.bf16.mxu1 %v3941_v34 }
 0x4fd   : > { %2749 = vmatpush1.bf16.msra.mxu0 %v3924_v15  ;;  %2813 = vmatpush1.bf16.msra.mxu1 %v3943_v38 }
 0x4fe   : > { %2751 = vmatprep.subr.bf16.mxu0 %v3927_v18  ;;  %2815 = vmatprep.subr.bf16.mxu1 %v3949_v46 }
 0x501   : > { %2753 = vmatpush1.bf16.msra.mxu0 %v3934_v27  ;;  %2817 = vmatpush1.bf16.msra.mxu1 %v3955_v49 }
 0x502   : > { %2755 = vmatprep.subr.bf16.mxu0 %v3938_v31  ;;  %2819 = vmatprep.subr.bf16.mxu1 %v3958_v53 }
 0x505   : > { %2757 = vmatpush1.bf16.msra.mxu0 %v3947_v43  ;;  %2821 = vmatpush1.bf16.msra.mxu1 %v3967_v63 }
 0x506   : > { %2759 = vmatprep.subr.bf16.mxu0 %v3952_v47  ;;  %2823 = vmatprep.subr.bf16.mxu1 %v3970_v1 }
 0x509   : > { %2761 = vmatpush1.bf16.msra.mxu0 %v3961_v56  ;;  %2825 = vmatpush1.bf16.msra.mxu1 %v3979_v14 }
 0x50a   : > { %2763 = vmatprep.subr.bf16.mxu0 %v3964_v59  ;;  %2827 = vmatprep.subr.bf16.mxu1 %v3982_v17 }
 0x50d   : > { %2765 = vmatpush1.bf16.msra.mxu0 %v3973_v7  ;;  %2829 = vmatpush1.bf16.msra.mxu1 %v3991_v32 }
 0x50e   : > { %2767 = vmatprep.subr.bf16.mxu0 %v3976_v8  ;;  %2831 = vmatprep.subr.bf16.mxu1 %v3994_v35 }
 0x511   : > { %2769 = vmatpush1.bf16.msra.mxu0 %v3985_v24  ;;  %2833 = vmatpush1.bf16.msra.mxu1 %v4003_v50 }
 0x512   : > { %2771 = vmatprep.subr.bf16.mxu0 %v3988_v25  ;;  %2835 = vmatprep.subr.bf16.mxu1 %v4006_v52 }
 0x515   : > { %2773 = vmatpush1.bf16.msra.mxu0 %v3997_v41  ;;  %2837 = vmatpush1.bf16.msra.mxu1 %v4015_v3 }
 0x516   : > { %2775 = vmatprep.subr.bf16.mxu0 %v4000_v42  ;;  %2839 = vmatprep.subr.bf16.mxu1 %v4018_v6 }
 0x519   : > { %2777 = vmatpush1.bf16.msra.mxu0 %v4009_v60  ;;  %2841 = vmatpush1.bf16.msra.mxu1 %v4027_v30 }
 0x51a   : > { %2779 = vmatprep.subr.bf16.mxu0 %v4012_v61  ;;  %2843 = vmatprep.subr.bf16.mxu1 %v4030_v33 }
 0x51d   : > { %2781 = vmatpush1.bf16.msra.mxu0 %v4021_v19  ;;  %2845 = vmatpush1.bf16.msra.mxu1 %v4039_v57 }
 0x51e   : > { %2783 = vmatprep.subr.bf16.mxu0 %v4024_v21  ;;  %2847 = vmatprep.subr.bf16.mxu1 %v4832_v2 }
 0x521   : > { %2785 = vmatpush1.bf16.msra.mxu0 %v4033_v45  ;;  %2849 = vmatpush1.bf16.msra.mxu1 %v4835_v62 }
 0x522   : > { %2787 = vmatprep.subr.bf16.mxu0 %v4036_v48  ;;  %2851 = vmatprep.subr.bf16.mxu1 %v4836_v20 }
 0x525   : > { %2789 = vmatpush1.bf16.msra.mxu0 %v4902_v0  ;;  %2853 = vmatpush1.bf16.msra.mxu1 %v4903_v22 }
 0x526   : > { %2791 = vmatprep.subr.bf16.mxu0 %v4904_v11  ;;  %2855 = vmatprep.subr.bf16.mxu1 %v4905_v4 }
 0x529   : > { %2793 = vmatpush1.bf16.msra.mxu0 %v4906_v23  ;;  %2857 = vmatpush1.bf16.msra.mxu1 %v4907_v28  ;;  %v4917_v23 = vld [vmem:[#allocation41_spill] sm:$0xff]  ;;  %v4918_v28 = vld [vmem:[#allocation39_spill] sm:$0xff] }
 0x52a   : > { %2795 = vmatprep.subr.bf16.mxu0 %v4908_v37  ;;  %2859 = vmatprep.subr.bf16.mxu1 %v4909_v55  ;;  %v4919_v37 = vld [vmem:[#allocation42_spill] sm:$0xff]  ;;  %v4920_v55 = vld [vmem:[#allocation20_spill] sm:$0xff] }
 0x52d   : > { %2797 = vmatpush1.bf16.msra.mxu0 %v4910_v5  ;;  %2861 = vmatpush1.bf16.msra.mxu1 %v4911_v51  ;;  %v4921_v5 = vld [vmem:[#allocation21_spill] sm:$0xff] }
 0x52e   : > { %2799 = vmatprep.subr.bf16.mxu0 %v4912_v12  ;;  %2863 = vmatprep.subr.bf16.mxu1 %v4913_v29 }
 0x531   : > { %2801 = vmatpush1.bf16.msra.mxu0 %v4914_v39  ;;  %2865 = vmatpush1.bf16.msra.mxu1 %v4915_v54 }
 0x532   : > { %2803 = vmatprep.subr.bf16.mxu0 %v4916_v13  ;;  %2867 = vmatprep.subr.bf16.mxu1 %v4917_v23 }
 0x535   : > { %2805 = vmatpush1.bf16.msra.mxu0 %v4918_v28  ;;  %2869 = vmatpush1.bf16.msra.mxu1 %v4919_v37 }
 0x536   : > { %2871 = vmatprep.subr.bf16.mxu0 %v4920_v55  ;;  %2935 = vmatprep.subr.bf16.mxu1 %v4921_v5 }
 0x5cb   : > { %v1253_v51 = vpop.f32.mrb[8].mxu0  ;;  %v1324_v12 = vpop.f32.mrb[8].mxu1 }
 0x5cc   : > { %v1254_v29 = vadd.f32 %v1253_v51, %v4861_v36  ;;  %v1255_v4 = vpop.f32.mrb[9].mxu0  ;;  %v1326_v39 = vpop.f32.mrb[9].mxu1  ;;  %v1325_v37 = vadd.f32 %v1324_v12, %v4184_v44  ;;  %v4925_v12 = vld [vmem:[#allocation30_spill] sm:$0xff] }
 0x5cd   : > { %v1256_v54 = vadd.f32 %v1255_v4, %v4177_v16  ;;  %v1327_v28 = vadd.f32 %v1326_v39, %v4181_v58 }
 0x5ce   : > { %v2072_v11 = vmul.f32 -1.442695, %v1254_v29 }
 0x5cf   : > { %v2073_v13 = vmul.f32 -1.442695, %v1256_v54  ;;  %v2074_v23 = vmul.f32 -1.442695, %v1327_v28 }
 0x5d0   : > { %3297 = vpow2.f32 %v2072_v11 }
 0x5d1   : > { %3299 = vpow2.f32 %v2073_v13 }
 0x5d2   : > { %3301 = vpow2.f32 %v2074_v23 }
 0x5d3   : > { %3303 = vtanh.f32 %v1325_v37 }
 0x5da   : > { %v3298_v55 = vpop.eup %3297 }
 0x5db   : > { %v3300_v5 = vpop.eup %3299  ;;  %v1332_v22 = vadd.f32 1.0, %v3298_v55 }
 0x5dc   : > { %v1338_v0 = vadd.f32 1.0, %v3300_v5  ;;  %v3302_v4 = vpop.eup %3301  ;;  %v2076_v5 = vld [vmem:[%s3898_s11 + $0x28] sm:$0xff] }
 0x5dd   : > { %3305 = vrcp.f32 %v1332_v22  ;;  %v3304_v51 = vpop.eup %3303  ;;  %v1345_v11 = vadd.f32 1.0, %v3302_v4  ;;  %v4924_v22 = vld [vmem:[#allocation24_spill] sm:$0xff]  ;;  %v4926_v4 = vld [vmem:[#allocation27_spill] sm:$0xff] }
 0x5de   : > { %3307 = vrcp.f32 %v1338_v0  ;;  %v4923_v0 = vld [vmem:[#allocation29_spill] sm:$0xff] }
 0x5df   : > { %3309 = vrcp.f32 %v1345_v11  ;;  %v4929_v11 = vld [vmem:[#allocation34_spill] sm:$0xff] }
 0x5e7   : > { %v3306_v29 = vpop.eup %3305 }
 0x5e8   : > { %v3308_v54 = vpop.eup %3307  ;;  %v1349_v13 = vmul.f32 %v3306_v29, %v3304_v51  ;;  %v4927_v51 = vld [vmem:[#allocation33_spill] sm:$0xff]  ;;  %v4928_v29 = vld [vmem:[#allocation28_spill] sm:$0xff] }
 0x5e9   : > { %v1348_v28 = vmul.f32 %v3308_v54, %v4409_v40  ;;  %v3310_v23 = vpop.eup %3309  ;;  %v4922_v40 = vld [vmem:[#allocation23_spill] sm:$0xff] }
 0x5ea   : > { %v4930_v54 = vld [vmem:[#allocation31_spill] sm:$0xff] }
 0x5eb   : > { %v4483_v39 = vadd.f32 %v1349_v13, %v1348_v28  ;;  %v4931_v13 = vld [vmem:[#allocation37_spill] sm:$0xff]  ;;  %v4932_v28 = vld [vmem:[#allocation32_spill] sm:$0xff] }
 0x5ed   : > { %3311 = vtanh.f32 %v4483_v39 }
 0x5f7   : > { %v3312_v37 = vpop.eup %3311 }
 0x5f8   : > { %v1352_v55 = vmul.f32 %v3312_v37, %v3310_v23  ;;  %v4933_v23 = vld [vmem:[#allocation38_spill] sm:$0xff]  ;;  %v4934_v37 = vld [vmem:[#allocation35_spill] sm:$0xff] }
 0x5fa   : > { %2075 = vst [vmem:[%s3912_s9 + $0x20] sm:$0xff] %v1352_v55  ;;  %1421 = vmatprep.mubr.f32.mxu0 %v1352_v55  ;;  %1492 = vmatprep.mubr.f32.mxu1 %v1352_v55  ;;  %v4935_v55 = vld [vmem:[#allocation40_spill] sm:$0xff] }
 0x5fb   : > { %1422 = vmatmul.mubr.f32.vlgmr.msra.gmra.mrb[10].mxu0 %v2076_v5  ;;  %1493 = vmatmul.mubr.f32.vlgmr.msra.gmra.mrb[10].mxu1 %v2076_v5  ;;  %v4936_v5 = vld [vmem:[#allocation36_spill] sm:$0xff] }
 0x5fc   : > { %2873 = vmatpush1.bf16.msra.mxu0 %v3918_v9  ;;  %2937 = vmatpush1.bf16.msra.mxu1 %v3931_v26 }
 0x5fd   : > { %2875 = vmatprep.subr.bf16.mxu0 %v3920_v10  ;;  %2939 = vmatprep.subr.bf16.mxu1 %v3941_v34 }
 0x600   : > { %2877 = vmatpush1.bf16.msra.mxu0 %v3924_v15  ;;  %2941 = vmatpush1.bf16.msra.mxu1 %v3943_v38 }
 0x601   : > { %2879 = vmatprep.subr.bf16.mxu0 %v3927_v18  ;;  %2943 = vmatprep.subr.bf16.mxu1 %v3949_v46 }
 0x604   : > { %2881 = vmatpush1.bf16.msra.mxu0 %v3934_v27  ;;  %2945 = vmatpush1.bf16.msra.mxu1 %v3955_v49 }
 0x605   : > { %2883 = vmatprep.subr.bf16.mxu0 %v3938_v31  ;;  %2947 = vmatprep.subr.bf16.mxu1 %v3958_v53 }
 0x608   : > { %2885 = vmatpush1.bf16.msra.mxu0 %v3947_v43  ;;  %2949 = vmatpush1.bf16.msra.mxu1 %v3967_v63 }
 0x609   : > { %2887 = vmatprep.subr.bf16.mxu0 %v3952_v47  ;;  %2951 = vmatprep.subr.bf16.mxu1 %v3970_v1 }
 0x60c   : > { %2889 = vmatpush1.bf16.msra.mxu0 %v3961_v56  ;;  %2953 = vmatpush1.bf16.msra.mxu1 %v3979_v14 }
 0x60d   : > { %2891 = vmatprep.subr.bf16.mxu0 %v3964_v59  ;;  %2955 = vmatprep.subr.bf16.mxu1 %v3982_v17 }
 0x610   : > { %2893 = vmatpush1.bf16.msra.mxu0 %v3973_v7  ;;  %2957 = vmatpush1.bf16.msra.mxu1 %v3991_v32 }
 0x611   : > { %2895 = vmatprep.subr.bf16.mxu0 %v3976_v8  ;;  %2959 = vmatprep.subr.bf16.mxu1 %v3994_v35 }
 0x614   : > { %2897 = vmatpush1.bf16.msra.mxu0 %v3985_v24  ;;  %2961 = vmatpush1.bf16.msra.mxu1 %v4003_v50 }
 0x615   : > { %2899 = vmatprep.subr.bf16.mxu0 %v3988_v25  ;;  %2963 = vmatprep.subr.bf16.mxu1 %v4006_v52 }
 0x618   : > { %2901 = vmatpush1.bf16.msra.mxu0 %v3997_v41  ;;  %2965 = vmatpush1.bf16.msra.mxu1 %v4015_v3 }
 0x619   : > { %2903 = vmatprep.subr.bf16.mxu0 %v4000_v42  ;;  %2967 = vmatprep.subr.bf16.mxu1 %v4018_v6 }
 0x61c   : > { %2905 = vmatpush1.bf16.msra.mxu0 %v4009_v60  ;;  %2969 = vmatpush1.bf16.msra.mxu1 %v4027_v30 }
 0x61d   : > { %2907 = vmatprep.subr.bf16.mxu0 %v4012_v61  ;;  %2971 = vmatprep.subr.bf16.mxu1 %v4030_v33 }
 0x620   : > { %2909 = vmatpush1.bf16.msra.mxu0 %v4021_v19  ;;  %2973 = vmatpush1.bf16.msra.mxu1 %v4039_v57 }
 0x621   : > { %2911 = vmatprep.subr.bf16.mxu0 %v4024_v21  ;;  %2975 = vmatprep.subr.bf16.mxu1 %v4832_v2 }
 0x624   : > { %2913 = vmatpush1.bf16.msra.mxu0 %v4033_v45  ;;  %2977 = vmatpush1.bf16.msra.mxu1 %v4835_v62 }
 0x625   : > { %2915 = vmatprep.subr.bf16.mxu0 %v4036_v48  ;;  %2979 = vmatprep.subr.bf16.mxu1 %v4836_v20 }
 0x628   : > { %2917 = vmatpush1.bf16.msra.mxu0 %v4922_v40  ;;  %2981 = vmatpush1.bf16.msra.mxu1 %v4923_v0 }
 0x629   : > { %2919 = vmatprep.subr.bf16.mxu0 %v4924_v22  ;;  %2983 = vmatprep.subr.bf16.mxu1 %v4925_v12 }
 0x62c   : > { %2921 = vmatpush1.bf16.msra.mxu0 %v4926_v4  ;;  %2985 = vmatpush1.bf16.msra.mxu1 %v4927_v51  ;;  %v4937_v4 = vld [vmem:[#allocation41_spill] sm:$0xff]  ;;  %v4938_v51 = vld [vmem:[#allocation39_spill] sm:$0xff] }
 0x62d   : > { %2923 = vmatprep.subr.bf16.mxu0 %v4928_v29  ;;  %2987 = vmatprep.subr.bf16.mxu1 %v4929_v11  ;;  %v4939_v29 = vld [vmem:[#allocation42_spill] sm:$0xff]  ;;  %v4940_v11 = vld [vmem:[#allocation20_spill] sm:$0xff] }
 0x630   : > { %2925 = vmatpush1.bf16.msra.mxu0 %v4930_v54  ;;  %2989 = vmatpush1.bf16.msra.mxu1 %v4931_v13  ;;  %v4941_v54 = vld [vmem:[#allocation21_spill] sm:$0xff] }
 0x631   : > { %2927 = vmatprep.subr.bf16.mxu0 %v4932_v28  ;;  %2991 = vmatprep.subr.bf16.mxu1 %v4933_v23 }
 0x634   : > { %2929 = vmatpush1.bf16.msra.mxu0 %v4934_v37  ;;  %2993 = vmatpush1.bf16.msra.mxu1 %v4935_v55 }
 0x635   : > { %2931 = vmatprep.subr.bf16.mxu0 %v4936_v5  ;;  %2995 = vmatprep.subr.bf16.mxu1 %v4937_v4 }
 0x638   : > { %2933 = vmatpush1.bf16.msra.mxu0 %v4938_v51  ;;  %2997 = vmatpush1.bf16.msra.mxu1 %v4939_v29 }
 0x639   : > { %2999 = vmatprep.subr.bf16.mxu0 %v4940_v11  ;;  %3063 = vmatprep.subr.bf16.mxu1 %v4941_v54 }
 0x6ce   : > { %v1423_v13 = vpop.f32.mrb[10].mxu0  ;;  %v1494_v28 = vpop.f32.mrb[10].mxu1 }
 0x6cf   : > { %v1424_v23 = vadd.f32 %v1423_v13, %v4861_v36  ;;  %v1425_v12 = vpop.f32.mrb[11].mxu0  ;;  %v1496_v37 = vpop.f32.mrb[11].mxu1  ;;  %v1495_v29 = vadd.f32 %v1494_v28, %v4184_v44 }
 0x6d0   : > { %v1426_v55 = vadd.f32 %v1425_v12, %v4177_v16  ;;  %v1497_v51 = vadd.f32 %v1496_v37, %v4181_v58 }
 0x6d1   : > { %v2077_v22 = vmul.f32 -1.442695, %v1424_v23 }
 0x6d2   : > { %v2078_v5 = vmul.f32 -1.442695, %v1426_v55  ;;  %v2079_v4 = vmul.f32 -1.442695, %v1497_v51 }
 0x6d3   : > { %3313 = vpow2.f32 %v2077_v22 }
 0x6d4   : > { %3315 = vpow2.f32 %v2078_v5 }
 0x6d5   : > { %3317 = vpow2.f32 %v2079_v4 }
 0x6d6   : > { %3319 = vtanh.f32 %v1495_v29 }
 0x6dd   : > { %v3314_v11 = vpop.eup %3313 }
 0x6de   : > { %v3316_v54 = vpop.eup %3315  ;;  %v1502_v0 = vadd.f32 1.0, %v3314_v11  ;;  %v2081_v11 = vld [vmem:[%s3898_s11 + $0x30] sm:$0xff] }
 0x6df   : > { %v1508_v40 = vadd.f32 1.0, %v3316_v54  ;;  %v3318_v12 = vpop.eup %3317 }
 0x6e0   : > { %3321 = vrcp.f32 %v1502_v0  ;;  %v3320_v13 = vpop.eup %3319  ;;  %v1515_v22 = vadd.f32 1.0, %v3318_v12 }
 0x6e1   : > { %3323 = vrcp.f32 %v1508_v40 }
 0x6e2   : > { %3325 = vrcp.f32 %v1515_v22 }
 0x6ea   : > { %v3322_v23 = vpop.eup %3321 }
 0x6eb   : > { %v3324_v55 = vpop.eup %3323  ;;  %v1519_v5 = vmul.f32 %v3322_v23, %v3320_v13 }
 0x6ec   : > { %v1518_v51 = vmul.f32 %v3324_v55, %v4483_v39  ;;  %v3326_v4 = vpop.eup %3325  ;;  %v2086_v39 = vld [vmem:[%s3898_s11 + $0x38] sm:$0xff] }
 0x6ee   : > { %v4557_v37 = vadd.f32 %v1519_v5, %v1518_v51 }
 0x6f0   : > { %3327 = vtanh.f32 %v4557_v37 }
 0x6fa   : > { %v3328_v29 = vpop.eup %3327 }
 0x6fb   : > { %v1522_v28 = vmul.f32 %v3328_v29, %v3326_v4 }
 0x6fd   : > { %2080 = vst [vmem:[%s3912_s9 + $0x28] sm:$0xff] %v1522_v28  ;;  %1591 = vmatprep.mubr.f32.mxu0 %v1522_v28  ;;  %1662 = vmatprep.mubr.f32.mxu1 %v1522_v28 }
 0x6fe   : > { %1592 = vmatmul.mubr.f32.vlgmr.msra.gmra.mrb[12].mxu0 %v2081_v11  ;;  %1663 = vmatmul.mubr.f32.vlgmr.msra.gmra.mrb[12].mxu1 %v2081_v11 }
 0x6ff   : > { %3001 = vmatpush1.bf16.msra.mxu0 %v3918_v9  ;;  %3065 = vmatpush1.bf16.msra.mxu1 %v3931_v26  ;;  %v4942_v9 = vld [vmem:[#allocation23_spill] sm:$0xff] }
 0x700   : > { %3003 = vmatprep.subr.bf16.mxu0 %v3920_v10  ;;  %3067 = vmatprep.subr.bf16.mxu1 %v3941_v34  ;;  %v4943_v10 = vld [vmem:[#allocation29_spill] sm:$0xff]  ;;  %v4946_v26 = vld [vmem:[#allocation27_spill] sm:$0xff]  ;;  %v4949_v34 = vld [vmem:[#allocation34_spill] sm:$0xff] }
 0x703   : > { %3005 = vmatpush1.bf16.msra.mxu0 %v3924_v15  ;;  %3069 = vmatpush1.bf16.msra.mxu1 %v3943_v38  ;;  %v4944_v15 = vld [vmem:[#allocation24_spill] sm:$0xff]  ;;  %v4950_v38 = vld [vmem:[#allocation31_spill] sm:$0xff] }
 0x704   : > { %3007 = vmatprep.subr.bf16.mxu0 %v3927_v18  ;;  %3071 = vmatprep.subr.bf16.mxu1 %v3949_v46  ;;  %v4945_v18 = vld [vmem:[#allocation30_spill] sm:$0xff]  ;;  %v4952_v46 = vld [vmem:[#allocation32_spill] sm:$0xff] }
 0x707   : > { %3009 = vmatpush1.bf16.msra.mxu0 %v3934_v27  ;;  %3073 = vmatpush1.bf16.msra.mxu1 %v3955_v49  ;;  %v4947_v27 = vld [vmem:[#allocation33_spill] sm:$0xff]  ;;  %v4954_v49 = vld [vmem:[#allocation35_spill] sm:$0xff] }
 0x708   : > { %3011 = vmatprep.subr.bf16.mxu0 %v3938_v31  ;;  %3075 = vmatprep.subr.bf16.mxu1 %v3958_v53  ;;  %v4948_v31 = vld [vmem:[#allocation28_spill] sm:$0xff] }
 0x709   : > { %v4955_v53 = vld [vmem:[#allocation40_spill] sm:$0xff] }
 0x70b   : > { %3013 = vmatpush1.bf16.msra.mxu0 %v3947_v43  ;;  %3077 = vmatpush1.bf16.msra.mxu1 %v3967_v63  ;;  %v4951_v43 = vld [vmem:[#allocation37_spill] sm:$0xff]  ;;  %v4958_v63 = vld [vmem:[#allocation39_spill] sm:$0xff] }
 0x70c   : > { %3015 = vmatprep.subr.bf16.mxu0 %v3952_v47  ;;  %3079 = vmatprep.subr.bf16.mxu1 %v3970_v1  ;;  %v4953_v47 = vld [vmem:[#allocation38_spill] sm:$0xff] }
 0x70d   : > { %v4959_v1 = vld [vmem:[#allocation42_spill] sm:$0xff] }
 0x70f   : > { %3017 = vmatpush1.bf16.msra.mxu0 %v3961_v56  ;;  %3081 = vmatpush1.bf16.msra.mxu1 %v3979_v14  ;;  %v4956_v56 = vld [vmem:[#allocation36_spill] sm:$0xff] }
 0x710   : > { %3019 = vmatprep.subr.bf16.mxu0 %v3964_v59  ;;  %3083 = vmatprep.subr.bf16.mxu1 %v3982_v17  ;;  %v4957_v59 = vld [vmem:[#allocation41_spill] sm:$0xff] }
 0x713   : > { %3021 = vmatpush1.bf16.msra.mxu0 %v3973_v7  ;;  %3085 = vmatpush1.bf16.msra.mxu1 %v3991_v32 }
 0x714   : > { %3023 = vmatprep.subr.bf16.mxu0 %v3976_v8  ;;  %3087 = vmatprep.subr.bf16.mxu1 %v3994_v35 }
 0x717   : > { %3025 = vmatpush1.bf16.msra.mxu0 %v3985_v24  ;;  %3089 = vmatpush1.bf16.msra.mxu1 %v4003_v50 }
 0x718   : > { %3027 = vmatprep.subr.bf16.mxu0 %v3988_v25  ;;  %3091 = vmatprep.subr.bf16.mxu1 %v4006_v52 }
 0x71b   : > { %3029 = vmatpush1.bf16.msra.mxu0 %v3997_v41  ;;  %3093 = vmatpush1.bf16.msra.mxu1 %v4015_v3 }
 0x71c   : > { %3031 = vmatprep.subr.bf16.mxu0 %v4000_v42  ;;  %3095 = vmatprep.subr.bf16.mxu1 %v4018_v6 }
 0x71f   : > { %3033 = vmatpush1.bf16.msra.mxu0 %v4009_v60  ;;  %3097 = vmatpush1.bf16.msra.mxu1 %v4027_v30 }
 0x720   : > { %3035 = vmatprep.subr.bf16.mxu0 %v4012_v61  ;;  %3099 = vmatprep.subr.bf16.mxu1 %v4030_v33 }
 0x723   : > { %3037 = vmatpush1.bf16.msra.mxu0 %v4021_v19  ;;  %3101 = vmatpush1.bf16.msra.mxu1 %v4039_v57 }
 0x724   : > { %3039 = vmatprep.subr.bf16.mxu0 %v4024_v21  ;;  %3103 = vmatprep.subr.bf16.mxu1 %v4832_v2 }
 0x727   : > { %3041 = vmatpush1.bf16.msra.mxu0 %v4033_v45  ;;  %3105 = vmatpush1.bf16.msra.mxu1 %v4835_v62 }
 0x728   : > { %3043 = vmatprep.subr.bf16.mxu0 %v4036_v48  ;;  %3107 = vmatprep.subr.bf16.mxu1 %v4836_v20 }
 0x72b   : > { %3045 = vmatpush1.bf16.msra.mxu0 %v4942_v9  ;;  %3109 = vmatpush1.bf16.msra.mxu1 %v4943_v10 }
 0x72c   : > { %3047 = vmatprep.subr.bf16.mxu0 %v4944_v15  ;;  %3111 = vmatprep.subr.bf16.mxu1 %v4945_v18 }
 0x72f   : > { %3049 = vmatpush1.bf16.msra.mxu0 %v4946_v26  ;;  %3113 = vmatpush1.bf16.msra.mxu1 %v4947_v27 }
 0x730   : > { %3051 = vmatprep.subr.bf16.mxu0 %v4948_v31  ;;  %3115 = vmatprep.subr.bf16.mxu1 %v4949_v34 }
 0x733   : > { %3053 = vmatpush1.bf16.msra.mxu0 %v4950_v38  ;;  %3117 = vmatpush1.bf16.msra.mxu1 %v4951_v43 }
 0x734   : > { %3055 = vmatprep.subr.bf16.mxu0 %v4952_v46  ;;  %3119 = vmatprep.subr.bf16.mxu1 %v4953_v47 }
 0x737   : > { %3057 = vmatpush1.bf16.msra.mxu0 %v4954_v49  ;;  %3121 = vmatpush1.bf16.msra.mxu1 %v4955_v53 }
 0x738   : > { %3059 = vmatprep.subr.bf16.mxu0 %v4956_v56  ;;  %3123 = vmatprep.subr.bf16.mxu1 %v4957_v59 }
 0x73b   : > { %3061 = vmatpush1.bf16.msra.mxu0 %v4958_v63  ;;  %3125 = vmatpush1.bf16.msra.mxu1 %v4959_v1 }
 0x7d1   : > { %v1593_v7 = vpop.f32.mrb[12].mxu0  ;;  %v1664_v8 = vpop.f32.mrb[12].mxu1 }
 0x7d2   : > { %v1594_v14 = vadd.f32 %v1593_v7, %v4861_v36  ;;  %v1595_v17 = vpop.f32.mrb[13].mxu0  ;;  %v1666_v24 = vpop.f32.mrb[13].mxu1  ;;  %v1665_v50 = vadd.f32 %v1664_v8, %v4184_v44 }
 0x7d3   : > { %v1596_v25 = vadd.f32 %v1595_v17, %v4177_v16  ;;  %v1667_v41 = vadd.f32 %v1666_v24, %v4181_v58 }
 0x7d4   : > { %v2082_v32 = vmul.f32 -1.442695, %v1594_v14 }
 0x7d5   : > { %v2083_v35 = vmul.f32 -1.442695, %v1596_v25  ;;  %v2084_v42 = vmul.f32 -1.442695, %v1667_v41 }
 0x7d6   : > { %3329 = vpow2.f32 %v2082_v32 }
 0x7d7   : > { %3331 = vpow2.f32 %v2083_v35 }
 0x7d8   : > { %3333 = vpow2.f32 %v2084_v42 }
 0x7d9   : > { %3335 = vtanh.f32 %v1665_v50 }
 0x7e0   : > { %v3330_v52 = vpop.eup %3329 }
 0x7e1   : > { %v3332_v60 = vpop.eup %3331  ;;  %v1672_v61 = vadd.f32 1.0, %v3330_v52 }
 0x7e2   : > { %v1678_v3 = vadd.f32 1.0, %v3332_v60  ;;  %v3334_v6 = vpop.eup %3333 }
 0x7e3   : > { %3337 = vrcp.f32 %v1672_v61  ;;  %v3336_v19 = vpop.eup %3335  ;;  %v1685_v30 = vadd.f32 1.0, %v3334_v6 }
 0x7e4   : > { %3339 = vrcp.f32 %v1678_v3 }
 0x7e5   : > { %3341 = vrcp.f32 %v1685_v30 }
 0x7ed   : > { %v3338_v21 = vpop.eup %3337 }
 0x7ee   : > { %v3340_v33 = vpop.eup %3339  ;;  %v1689_v45 = vmul.f32 %v3338_v21, %v3336_v19 }
 0x7ef   : > { %v1688_v48 = vmul.f32 %v3340_v33, %v4557_v37  ;;  %v3342_v2 = vpop.eup %3341 }
 0x7f1   : > { %v1690_v57 = vadd.f32 %v1689_v45, %v1688_v48 }
 0x7f3   : > { %3343 = vtanh.f32 %v1690_v57 }
 0x7fd   : > { %v3344_v62 = vpop.eup %3343 }
 0x7fe   : > { %v1692_v20 = vmul.f32 %v3344_v62, %v3342_v2 }
 0x800   : > { %2085 = vst [vmem:[%s3912_s9 + $0x30] sm:$0xff] %v1692_v20  ;;  %1761 = vmatprep.mubr.f32.mxu0 %v1692_v20  ;;  %1832 = vmatprep.mubr.f32.mxu1 %v1692_v20 }
 0x801   : > { %1762 = vmatmul.mubr.f32.vlgmr.msra.gmra.mrb[14].mxu0 %v2086_v39  ;;  %1833 = vmatmul.mubr.f32.vlgmr.msra.gmra.mrb[14].mxu1 %v2086_v39 }
 0x8d4   : > { %v1763_v40 = vpop.f32.mrb[14].mxu0  ;;  %v1834_v0 = vpop.f32.mrb[14].mxu1 }
 0x8d5   : > { %v1764_v54 = vadd.f32 %v1763_v40, %v4861_v36  ;;  %v1765_v12 = vpop.f32.mrb[15].mxu0  ;;  %v1836_v13 = vpop.f32.mrb[15].mxu1  ;;  %v1835_v37 = vadd.f32 %v1834_v0, %v4184_v44 }
 0x8d6   : > { %v1766_v23 = vadd.f32 %v1765_v12, %v4177_v16  ;;  %v1837_v5 = vadd.f32 %v1836_v13, %v4181_v58 }
 0x8d7   : > { %v2087_v22 = vmul.f32 -1.442695, %v1764_v54 }
 0x8d8   : > { %v2088_v55 = vmul.f32 -1.442695, %v1766_v23  ;;  %v2089_v51 = vmul.f32 -1.442695, %v1837_v5 }
 0x8d9   : > { %3345 = vpow2.f32 %v2087_v22 }
 0x8da   : > { %3347 = vpow2.f32 %v2088_v55 }
 0x8db   : > { %3349 = vpow2.f32 %v2089_v51 }
 0x8dc   : > { %3351 = vtanh.f32 %v1835_v37 }
 0x8e3   : > { %v3346_v4 = vpop.eup %3345 }
 0x8e4   : > { %v3348_v29 = vpop.eup %3347  ;;  %v1842_v28 = vadd.f32 1.0, %v3346_v4 }
 0x8e5   : > { %v1848_v11 = vadd.f32 1.0, %v3348_v29  ;;  %v3350_v36 = vpop.eup %3349 }
 0x8e6   : > { %3353 = vrcp.f32 %v1842_v28  ;;  %v3352_v16 = vpop.eup %3351  ;;  %v1855_v10 = vadd.f32 1.0, %v3350_v36 }
 0x8e7   : > { %3355 = vrcp.f32 %v1848_v11 }
 0x8e8   : > { %3357 = vrcp.f32 %v1855_v10 }
 0x8f0   : > { %v3354_v9 = vpop.eup %3353 }
 0x8f1   : > { %v3356_v15 = vpop.eup %3355  ;;  %v1859_v18 = vmul.f32 %v3354_v9, %v3352_v16 }
 0x8f2   : > { %v1858_v58 = vmul.f32 %v3356_v15, %v1690_v57  ;;  %v3358_v44 = vpop.eup %3357 }
 0x8f4   : > { %v1860_v26 = vadd.f32 %v1859_v18, %v1858_v58 }
 0x8f6   : > { %1866 = vst [vmem:[#allocation14] sm:$0xff] %v1860_v26  ;;  %3359 = vtanh.f32 %v1860_v26 }
 0x900   : > { %v3360_v27 = vpop.eup %3359 }
 0x901   : > { %v1862_v31 = vmul.f32 %v3360_v27, %v3358_v44 }
 0x903   : > { %2090 = vst [vmem:[%s3912_s9 + $0x38] sm:$0xff] %v1862_v31  ;;  %1865 = vst [vmem:[#allocation12] sm:$0xff] %v1862_v31 }
 0x904   : > { %3516 = shalt.err (!%p3513_p5)
}
 0x905   : > { %s3517_s30 = scalar_lea.hbm %s4740_s6, 128  ;;  %p4961_p8 = pmov %p4960_p9 }
 0x906   : > { %p3518_p12 = scmp.ne.s32.totalorder %s4740_s6, %s3517_s30  ;;  %p3523_p4 = scmp.lt.u32.totalorder %s3517_s30, %s4740_s6 }
 0x908   : > { %p3519_p10 = pnand %p3518_p12, %p4961_p8 }
 0x90a   : > { %p3520_p2 = pneg %p3519_p10 }
 0x90c   : > { %p3525_p6 = pnand %p3523_p4, %p3520_p2 }
 0x90e   : > { %3528 = shalt.err (!%p3525_p6)
}
 0x90f   : > { %p4962_p9 = pmov %p4961_p8  ;;  %s1868_s19 = scalar_lea.sflag [#allocation4], %s3894_s21 }
 0x910   : > { %s3529_s11 = scalar_lea.vmem %s4642_s15, 1024  ;;  %s3646_s30 = smov [#allocation11]  }
 0x911   : > { %3146 = dma.vmem_to_hbm [thread:$0]  (%p4962_p9), %s1896_s29, 128, %s4740_s6, [#allocation13]  }
 0x912   : > { %p3530_p3 = scmp.ne.s32.totalorder %s4642_s15, %s3529_s11  ;;  %s3533_s16 = sshll.u32 %s3646_s30, 4  ;;  %s3534_s16 = int_to_ptr.vmem [resolvable:$false] %s3533_s16 }
 0x913   : > { %s3535_s9 = scalar_lea.vmem %s3534_s16, 2048  ;;  %p3536_p0 = scmp.lt.s32.totalorder %s4642_s15, %s3534_s16 }
 0x914   : > { %p3531_p7 = pnand %p3530_p3, %p3842_p1  ;;  %p3537_p13 = scmp.lt.s32.totalorder %s3535_s9, %s3529_s11 }
 0x916   : > { %p3532_p11 = pneg %p3531_p7  ;;  %p3538_p5 = por %p3537_p13, %p3536_p0 }
 0x918   : > { %p3539_p12 = pnand %p3538_p5, %p3532_p11 }
 0x91a   : > { %3542 = shalt.err (!%p3539_p12)
}
 0x91b   : > { %s3543_s29 = scalar_lea.hbm %s4640_s17, 1024  ;;  %s3547_s10 = scalar_lea.hbm %s4739_s5, 2048 }
 0x91c   : > { %p3544_p8 = scmp.ne.s32.totalorder %s4640_s17, %s3543_s29  ;;  %p3548_p4 = scmp.lt.u32.totalorder %s4640_s17, %s4739_s5 }
 0x91d   : > { %p3549_p6 = scmp.lt.u32.totalorder %s3547_s10, %s3543_s29  ;;  %p3551_p3 = scmp.lt.u32.totalorder %s3543_s29, %s4640_s17 }
 0x91e   : > { %p3545_p10 = pnand %p3544_p8, %p3842_p1 }
 0x91f   : > { %p3550_p9 = por %p3549_p6, %p3548_p4 }
 0x920   : > { %p3546_p2 = pneg %p3545_p10 }
 0x921   : > { %p3552_p7 = por %p3551_p3, %p3550_p9 }
 0x923   : > { %p3553_p11 = pnand %p3552_p7, %p3546_p2 }
 0x925   : > { %3556 = shalt.err (!%p3553_p11)
}
 0x926   : > { %s3647_s11 = smov 128   ;;  %s3648_s16 = smov 8  }
 0x927   : > { %3144 = dma.vmem_to_hbm [thread:$0]  (%p3842_p1), %s4642_s15, 1024, %s4640_s17, %s1868_s19, %s3647_s11, %s3647_s11, %s3648_s16  }
 0x928   : > { %s3557_s9 = scalar_lea.vmem %s4645_s14, 128  ;;  %p4963_p13 = scmp.eq.s32.totalorder %s3710_s28, 1 }
 0x929   : > { %p3558_p0 = scmp.ne.s32.totalorder %s4645_s14, %s3557_s9  ;;  %p3564_p8 = scmp.lt.s32.totalorder %s4645_s14, %s4645_s14 }
 0x92a   : > { %p3565_p10 = scmp.lt.s32.totalorder %s3557_s9, %s3557_s9 }
 0x92b   : > { %p3559_p5 = pnand %p3558_p0, %p4963_p13 }
 0x92c   : > { %p3566_p2 = por %p3565_p10, %p3564_p8 }
 0x92d   : > { %p3560_p12 = pneg %p3559_p5 }
 0x92f   : > { %p3567_p4 = pnand %p3566_p2, %p3560_p12 }
 0x931   : > { %3570 = shalt.err (!%p3567_p4)
}
 0x932   : > { %s3571_s20 = scalar_lea.hbm %s4741_s7, 128  ;;  %p4964_p6 = pmov %p4963_p13 }
 0x933   : > { %p3572_p1 = scmp.ne.s32.totalorder %s4741_s7, %s3571_s20  ;;  %p3577_p7 = scmp.lt.u32.totalorder %s3571_s20, %s4741_s7 }
 0x935   : > { %p3573_p9 = pnand %p3572_p1, %p4964_p6 }
 0x937   : > { %p3574_p3 = pneg %p3573_p9 }
 0x939   : > { %p3579_p11 = pnand %p3577_p7, %p3574_p3 }
 0x93b   : > { %3582 = shalt.err (!%p3579_p11)
}
 0x93c   : > { %p4965_p0 = pmov %p4964_p6 }
 0x93e   : > { %3148 = dma.vmem_to_hbm [thread:$0]  (%p4965_p0), %s4645_s14, 128, %s4741_s7, [#allocation13]  }
 0x93f   : > { %p4966_p13 = pmov %p4965_p0 }
 0x940   : > { %p4967_p5 = pmov %p4965_p0 }
 0x941   : > { %3612 = dma.done.wait (%p4966_p13), [#allocation13], 256  }
 0x942   : > { %3614 = vsyncadd (%p4967_p5), [#allocation13], 4294967040 }
 0x943 PF: > { %s1926_s23 = sand.u32 1, %s3621_s24   ;;  %p4968_p12 = scmp.ne.s32.totalorder %s4795_s8, 0 }
 0x944   : > { %p4969_p8 = scmp.ge.s32.totalorder %s3633_s27, 2  ;;  %s1927_s30 = scalar_lea.sflag [#allocation4], %s1926_s23 }
 0x946   : > { %p3172_p10 = pnand %p4969_p8, %p4968_p12 }
 0x948   : > { %3616 = dma.done.wait (!%p3172_p10), %s1927_s30, 1024  }
 0x949   : > { %3618 = vsyncadd (!%p3172_p10), %s1927_s30, 4294966272  ;;  %p24_p2 = scmp.ge.s32.totalorder %s3832_s22, 4   ;;  %s4970_s24 = smov %s3625_s25 }
 0x94a   : > { %s4971_s25 = smov %s3629_s26  ;;  %s4972_s26 = smov %s3848_s18 }
 0x94b   : > { %s4973_s27 = smov %s3832_s22  ;;  %26 = sbr.rel (!%p24_p2) target bundleno = 8 (0x8), region = 135 }
 0x952   :  { %1932 = vsyncpa [#allocation3], 1 }
 0x953   :  { %1934 = vsyncpa [#allocation3 + $0x1], 1 }
 0x954   :  { %1935 = vsyncpa [#allocation6], 1 }
 0x955   :  { %1936 = vsyncpa [#allocation9], 1 }
 0x956   :  { %1937 = vsyncpa [#allocation4], 1 }
 0x957   :  { %1939 = vsyncpa [#allocation4 + $0x1], 1 }
 0x958   :  { %1940 = vsyncpa [#allocation13], 1 }

</bundles_post_ra>
